<compile_context>
chip_gen: v7x
topology: tpu7x:2x2x1
jax: 0.10.0
libtpu: 0.0.40
codegen_flags: <defaults>
</compile_context>

<pallas_src>
import jax
import jax.numpy as jnp
from jax import lax
from jax.experimental import pallas as pl
from jax.experimental.pallas import tpu as pltpu

NEG_SLOPE = 0.01          # PyTorch LeakyReLU default
HIDDEN = 10000            # metric[0] out_features
N_CLASSES = 55            # metric[2] out_features
C_PAD = 64                # lane padding for the class dim (was 128)
NUM_SPLITS = 2            # leading "parallel" grid axis (v7x: one per TensorCore)
H_TILE = 5120             # hidden-axis chunk per grid step


def _leaky_relu(x):
    return jnp.where(x > 0, x, NEG_SLOPE * x)


def metric_model_kernel(x_ref, w1_ref, b1_ref, w2_ref, w3_ref, o_ref):
    # x:  (B, D) f32     w1: (D, D) f32      b1: (1, D) f32
    # w2: (D, tH) bf16   w3: (C_PAD, tH) bf16
    # o:  (B, C_PAD) f32 -- per-core partial logits (leading split dim squeezed)
    k = pl.program_id(1)

    # self.linear: tiny, recomputed each step (cheaper than a carried scratch
    # and keeps the parallel core axis completely state-free).
    h1 = (jnp.dot(x_ref[...], w1_ref[...], preferred_element_type=jnp.float32)
          + b1_ref[...]).astype(jnp.bfloat16)

    # metric[0] chunk: (B, tH) = h1 @ W2[:, chunk]   (bf16 MXU, f32 accumulate)
    h2 = jnp.dot(h1, w2_ref[...], preferred_element_type=jnp.float32)
    # metric[1]: LeakyReLU (elementwise over H -> safe per chunk)
    h2 = _leaky_relu(h2).astype(jnp.bfloat16)

    # metric[2] partial: contract this H chunk against W3 (stored (C_PAD, H)).
    partial = lax.dot_general(
        h2, w3_ref[...],
        dimension_numbers=(((1,), (1,)), ((), ())),
        preferred_element_type=jnp.float32,
    )

    @pl.when(k == 0)
    def _():
        o_ref[...] = partial

    @pl.when(k > 0)
    def _():
        o_ref[...] += partial


@jax.jit
def metric_model_forward(x, w1_t, b1_2d, w2_p, w3_p):
    """x: (B, D) f32; w1_t: (D, D) f32 (pre-transposed); b1_2d: (1, D) f32;
    w2_p: (D, H_pad) bf16; w3_p: (C_PAD, H_pad) bf16 (lane-dense, zero-padded)."""
    B, D = x.shape
    h_pad = w2_p.shape[1]
    assert h_pad % (NUM_SPLITS * H_TILE) == 0 and w3_p.shape == (C_PAD, h_pad)
    n_per_split = h_pad // (NUM_SPLITS * H_TILE)

    partials = pl.pallas_call(
        metric_model_kernel,
        out_shape=jax.ShapeDtypeStruct((NUM_SPLITS, B, C_PAD), jnp.float32),
        grid_spec=pltpu.PrefetchScalarGridSpec(
            num_scalar_prefetch=0,
            grid=(NUM_SPLITS, n_per_split),
            in_specs=[
                pl.BlockSpec((B, D), lambda c, k: (0, 0)),       # x (resident)
                pl.BlockSpec((D, D), lambda c, k: (0, 0)),       # W1^T (resident)
                pl.BlockSpec((1, D), lambda c, k: (0, 0)),       # b1 (resident)
                pl.BlockSpec((D, H_TILE),                        # W2^T chunk
                             lambda c, k: (0, c * n_per_split + k)),
                pl.BlockSpec((C_PAD, H_TILE),                    # W3 chunk (C, H)
                             lambda c, k: (0, c * n_per_split + k)),
            ],
            # Per-core partial-logits block: indexed only by the parallel axis,
            # so the two TensorCores on v7x never touch the same output block.
            out_specs=pl.BlockSpec((None, B, C_PAD), lambda c, k: (c, 0, 0)),
        ),
        compiler_params=pltpu.CompilerParams(
            dimension_semantics=("parallel", "arbitrary"),
        ),
    )(x, w1_t, b1_2d, w2_p, w3_p)

    # Tiny epilogue (fused XLA, sub-microsecond): sum per-core partials, drop
    # the class padding, final LeakyReLU (metric[3]) + exact softmax (metric[4]).
    logits = jnp.sum(partials, axis=0)[:, :N_CLASSES]
    logits = _leaky_relu(logits)
    return jax.nn.softmax(logits, axis=1)


def init_params(key, input_data_dim):
    """PyTorch-layout params, mimicking nn.Linear's U(-1/sqrt(fan_in), .)."""
    k1, k2, k3, k4 = jax.random.split(key, 4)
    D = input_data_dim
    b = 1.0 / (D ** 0.5)
    w1 = jax.random.uniform(k1, (D, D), jnp.float32, -b, b)          # (out, in)
    b1 = jax.random.uniform(k2, (D,), jnp.float32, -b, b)
    w2 = jax.random.uniform(k3, (HIDDEN, D), jnp.float32, -b, b)     # (out, in)
    b3 = 1.0 / (HIDDEN ** 0.5)
    w3 = jax.random.uniform(k4, (N_CLASSES, HIDDEN), jnp.float32, -b3, b3)
    return w1, b1, w2, w3


def pack_params(w1, b1, w2, w3):
    """One-time repack into the kernel's HBM layout (bf16, lane-dense, padded)."""
    D = w1.shape[0]
    chunk = NUM_SPLITS * H_TILE
    h_pad = pl.cdiv(HIDDEN, chunk) * chunk                     # 10240

    w1_t = jnp.asarray(w1.T, jnp.float32)                      # x @ w1_t == x @ W1^T
    b1_2d = jnp.asarray(b1, jnp.float32).reshape(1, D)

    # W2: (H, D) -> (D, H) bf16, zero-pad H to h_pad.
    w2_p = jnp.zeros((D, h_pad), jnp.bfloat16).at[:, :HIDDEN].set(
        w2.T.astype(jnp.bfloat16))
    # W3: keep native (C, H) layout, bf16, pad C -> 64 and H -> h_pad.
    w3_p = jnp.zeros((C_PAD, h_pad), jnp.bfloat16).at[:N_CLASSES, :HIDDEN].set(
        w3.astype(jnp.bfloat16))
    return w1_t, b1_2d, w2_p, w3_p


if __name__ == "__main__":
    key = jax.random.PRNGKey(0)
    k_in, k_par = jax.random.split(key)

    batch = 16                 # weight DMA is B-independent; 16 keeps sublanes dense
    input_data_dim = 32

    x = jax.random.normal(k_in, (batch, input_data_dim), jnp.float32)
    w1, b1, w2, w3 = init_params(k_par, input_data_dim)
    w1_t, b1_2d, w2_p, w3_p = pack_params(w1, b1, w2, w3)

    out = metric_model_forward(x, w1_t, b1_2d, w2_p, w3_p)
    out = jax.block_until_ready(out)

    # Pure-JAX reference reproducing the kernel's storage quantization
    # (bf16 weights, bf16 h1/h2 MXU operands, f32 accumulation) so the
    # comparison isolates kernel plumbing from intentional precision choices.
    w2_q = w2_p[:, :HIDDEN]                              # (D, H) bf16
    w3_q = w3_p[:N_CLASSES, :HIDDEN]                     # (C, H) bf16
    h1 = (x @ w1.T + b1).astype(jnp.bfloat16)
    h2 = jnp.dot(h1, w2_q, preferred_element_type=jnp.float32)
    h2 = jnp.where(h2 > 0, h2, NEG_SLOPE * h2).astype(jnp.bfloat16)
    logits = jnp.dot(h2, w3_q.T, preferred_element_type=jnp.float32)
    logits = jnp.where(logits > 0, logits, NEG_SLOPE * logits)
    ref = jax.nn.softmax(logits, axis=1)

    assert out.shape == (batch, N_CLASSES), out.shape
    assert bool(jnp.allclose(jnp.sum(out, axis=1), 1.0, atol=1e-3)), \
        "softmax rows must sum to 1"
    assert bool(jnp.allclose(out, ref, atol=2e-3, rtol=2e-2)), \
        "mismatch vs reference"

    print("KERNEL_OK")
</pallas_src>

<mosaic_0001>
module attributes {stable_mosaic.version = 11 : i64} {
  func.func @metric_model_kernel(%arg0: i32, %arg1: i32, %arg2: memref<16x32xf32, #tpu.memory_space<vmem>>, %arg3: memref<32x32xf32, #tpu.memory_space<vmem>>, %arg4: memref<1x32xf32, #tpu.memory_space<vmem>>, %arg5: memref<32x5120xbf16, #tpu.memory_space<vmem>>, %arg6: memref<64x5120xbf16, #tpu.memory_space<vmem>>, %arg7: memref<1x16x64xf32, #tpu.memory_space<vmem>>) attributes {dimension_semantics = [#tpu.dimension_semantics<parallel>, #tpu.dimension_semantics<arbitrary>], iteration_bounds = array<i64: 2, 1>, scalar_prefetch = 0 : i64, scratch_operands = 0 : i64, tpu.core_type = #tpu.core_type<tc>, window_params = [{pipeline_mode = #tpu.pipeline_mode<synchronous>, transform_indices = @transform_0, window_bounds = array<i64: 16, 32>}, {pipeline_mode = #tpu.pipeline_mode<synchronous>, transform_indices = @transform_1, window_bounds = array<i64: 32, 32>}, {pipeline_mode = #tpu.pipeline_mode<synchronous>, transform_indices = @transform_2, window_bounds = array<i64: 1, 32>}, {transform_indices = @transform_3, window_bounds = array<i64: 32, 5120>}, {transform_indices = @transform_4, window_bounds = array<i64: 64, 5120>}, {transform_indices = @transform_5, window_bounds = array<i64: 1, 16, 64>}]} {
    %c0 = arith.constant 0 : index
    %c0_0 = arith.constant 0 : index
    %0 = vector.load %arg2[%c0, %c0_0] : memref<16x32xf32, #tpu.memory_space<vmem>>, vector<16x32xf32>
    %c0_1 = arith.constant 0 : index
    %c0_2 = arith.constant 0 : index
    %1 = vector.load %arg3[%c0_1, %c0_2] : memref<32x32xf32, #tpu.memory_space<vmem>>, vector<32x32xf32>
    %cst = arith.constant dense<0.000000e+00> : vector<16x32xf32>
    %2 = tpu.matmul %0, %1, %cst {dimension_numbers = #tpu.dot_dimension_numbers<[1], [0], [0], [1], [0, 0, 1, 1], [], []>} : vector<16x32xf32>, vector<32x32xf32>, vector<16x32xf32> -> vector<16x32xf32>
    %c0_3 = arith.constant 0 : index
    %c0_4 = arith.constant 0 : index
    %3 = vector.load %arg4[%c0_3, %c0_4] : memref<1x32xf32, #tpu.memory_space<vmem>>, vector<1x32xf32>
    %4 = vector.broadcast %3 : vector<1x32xf32> to vector<16x32xf32>
    %5 = arith.addf %2, %4 : vector<16x32xf32>
    %6 = arith.truncf %5 : vector<16x32xf32> to vector<16x32xbf16>
    %c0_5 = arith.constant 0 : index
    %c0_6 = arith.constant 0 : index
    %7 = vector.load %arg5[%c0_5, %c0_6] : memref<32x5120xbf16, #tpu.memory_space<vmem>>, vector<32x5120xbf16>
    %cst_7 = arith.constant dense<0.000000e+00> : vector<16x5120xf32>
    %8 = tpu.matmul %6, %7, %cst_7 {dimension_numbers = #tpu.dot_dimension_numbers<[1], [0], [0], [1], [0, 0, 1, 1], [], []>} : vector<16x32xbf16>, vector<32x5120xbf16>, vector<16x5120xf32> -> vector<16x5120xf32>
    %cst_8 = arith.constant 0.000000e+00 : f32
    %9 = vector.broadcast %cst_8 : f32 to vector<16x5120xf32>
    %10 = arith.cmpf ogt, %8, %9 : vector<16x5120xf32>
    %cst_9 = arith.constant 0.00999999977 : f32
    %11 = vector.broadcast %cst_9 : f32 to vector<16x5120xf32>
    %12 = arith.mulf %11, %8 : vector<16x5120xf32>
    %13 = arith.select %10, %8, %12 : vector<16x5120xi1>, vector<16x5120xf32>
    %14 = arith.truncf %13 : vector<16x5120xf32> to vector<16x5120xbf16>
    %c0_10 = arith.constant 0 : index
    %c0_11 = arith.constant 0 : index
    %15 = vector.load %arg6[%c0_10, %c0_11] : memref<64x5120xbf16, #tpu.memory_space<vmem>>, vector<64x5120xbf16>
    %cst_12 = arith.constant dense<0.000000e+00> : vector<16x64xf32>
    %16 = tpu.matmul %14, %15, %cst_12 {dimension_numbers = #tpu.dot_dimension_numbers<[1], [1], [0], [0], [0, 0, 1, 0], [], []>} : vector<16x5120xbf16>, vector<64x5120xbf16>, vector<16x64xf32> -> vector<16x64xf32>
    %c0_i32 = arith.constant 0 : i32
    %17 = arith.cmpi eq, %arg1, %c0_i32 : i32
    %18 = arith.extui %17 : i1 to i32
    %c0_i32_13 = arith.constant 0 : i32
    %19 = arith.cmpi ne, %18, %c0_i32_13 : i32
    scf.if %19 {
      %c0_16 = arith.constant 0 : index
      %c0_17 = arith.constant 0 : index
      %c0_18 = arith.constant 0 : index
      %23 = vector.load %arg7[%c0_16, %c0_17, %c0_18] : memref<1x16x64xf32, #tpu.memory_space<vmem>>, vector<1x16x64xf32>
      %24 = vector.shape_cast %23 : vector<1x16x64xf32> to vector<16x64xf32>
      %25 = vector.shape_cast %16 : vector<16x64xf32> to vector<1x16x64xf32>
      tpu.vector_store %arg7[%c0_16, %c0_17, %c0_18], %25 {strides = array<i32>} : memref<1x16x64xf32, #tpu.memory_space<vmem>>, vector<1x16x64xf32>,
    } else {
    }
    %c0_i32_14 = arith.constant 0 : i32
    %20 = arith.cmpi sgt, %arg1, %c0_i32_14 : i32
    %21 = arith.extui %20 : i1 to i32
    %c0_i32_15 = arith.constant 0 : i32
    %22 = arith.cmpi ne, %21, %c0_i32_15 : i32
    scf.if %22 {
      %c0_16 = arith.constant 0 : index
      %c0_17 = arith.constant 0 : index
      %c0_18 = arith.constant 0 : index
      %23 = vector.load %arg7[%c0_16, %c0_17, %c0_18] : memref<1x16x64xf32, #tpu.memory_space<vmem>>, vector<1x16x64xf32>
      %24 = vector.shape_cast %23 : vector<1x16x64xf32> to vector<16x64xf32>
      %25 = arith.addf %24, %16 : vector<16x64xf32>
      %c0_19 = arith.constant 0 : index
      %c0_20 = arith.constant 0 : index
      %c0_21 = arith.constant 0 : index
      %26 = vector.load %arg7[%c0_19, %c0_20, %c0_21] : memref<1x16x64xf32, #tpu.memory_space<vmem>>, vector<1x16x64xf32>
      %27 = vector.shape_cast %26 : vector<1x16x64xf32> to vector<16x64xf32>
      %28 = vector.shape_cast %25 : vector<16x64xf32> to vector<1x16x64xf32>
      tpu.vector_store %arg7[%c0_19, %c0_20, %c0_21], %28 {strides = array<i32>} : memref<1x16x64xf32, #tpu.memory_space<vmem>>, vector<1x16x64xf32>,
    } else {
    }
    return
  }
  func.func @transform_0(%arg0: i32, %arg1: i32) -> (i32, i32) {
    %c0_i32 = arith.constant 0 : i32
    %c0_i32_0 = arith.constant 0 : i32
    %c0_i32_1 = arith.constant 0 : i32
    return %c0_i32, %c0_i32_0 : i32, i32
  }
  func.func @transform_1(%arg0: i32, %arg1: i32) -> (i32, i32) {
    %c0_i32 = arith.constant 0 : i32
    %c0_i32_0 = arith.constant 0 : i32
    %c0_i32_1 = arith.constant 0 : i32
    return %c0_i32, %c0_i32_0 : i32, i32
  }
  func.func @transform_2(%arg0: i32, %arg1: i32) -> (i32, i32) {
    %c0_i32 = arith.constant 0 : i32
    %c0_i32_0 = arith.constant 0 : i32
    %c0_i32_1 = arith.constant 0 : i32
    return %c0_i32, %c0_i32_0 : i32, i32
  }
  func.func @transform_3(%arg0: i32, %arg1: i32) -> (i32, i32) {
    %c1_i32 = arith.constant 1 : i32
    %0 = arith.muli %arg0, %c1_i32 : i32
    %1 = arith.addi %0, %arg1 : i32
    %c0_i32 = arith.constant 0 : i32
    %c0_i32_0 = arith.constant 0 : i32
    return %c0_i32, %1 : i32, i32
  }
  func.func @transform_4(%arg0: i32, %arg1: i32) -> (i32, i32) {
    %c1_i32 = arith.constant 1 : i32
    %0 = arith.muli %arg0, %c1_i32 : i32
    %1 = arith.addi %0, %arg1 : i32
    %c0_i32 = arith.constant 0 : i32
    %c0_i32_0 = arith.constant 0 : i32
    return %c0_i32, %1 : i32, i32
  }
  func.func @transform_5(%arg0: i32, %arg1: i32) -> (i32, i32, i32) {
    %c0_i32 = arith.constant 0 : i32
    %c0_i32_0 = arith.constant 0 : i32
    %c0_i32_1 = arith.constant 0 : i32
    return %arg0, %c0_i32, %c0_i32_0 : i32, i32, i32
  }
}

</mosaic_0001>

<bundles_post_ra>
// kernel: metric_model_forward.1
= control target key start
LH: loop header
LB: loop body
LE: loop exit
PB: predicated region body
PF: predicated region fallthrough
CT: control target
= control target key end

     0   :  { %s5818_s0 = inlined_call_operand.hbm [shape: f32[16,32], index: 0, kind: input, shape index: {}]   ;;  %s5819_s1 = inlined_call_operand.hbm [shape: f32[32,32], index: 1, kind: input, shape index: {}]   ;;  %s5820_s2 = inlined_call_operand.hbm [shape: f32[1,32], index: 2, kind: input, shape index: {}]   ;;  %s5821_s3 = inlined_call_operand.hbm [shape: bf16[32,10240], index: 3, kind: input, shape index: {}]   ;;  %s5822_s4 = inlined_call_operand.hbm [shape: bf16[64,10240], index: 4, kind: input, shape index: {}]   ;;  %s5823_s5 = inlined_call_operand.vmem [shape: f32[2,16,64], index: 5, kind: output, shape index: {}]  }
   0x1   :  { %5862 = sst [smem:[#allocation37_spill]] %s5819_s1 }
   0x2   :  { %5863 = sst [smem:[#allocation38_spill]] %s5821_s3 }
   0x3   :  { %5864 = sst [smem:[#allocation39_spill]] %s5823_s5 }
   0x4   :  { %10 = vsyncpa [#allocation3], 0 }
   0x5   :  { %11 = vsyncpa [#allocation5], 0 }
   0x6   :  { %12 = vsyncpa [#allocation8], 0 }
   0x7   :  { %14 = vsyncpa [#allocation8 + $0x1], 0  ;;  %s4720_s18 = smov 0   ;;  %s4722_s19 = smov 0  }
   0x8   :  { %s4724_s20 = smov 0   ;;  %s4726_s21 = smov 0  }
   0x9   :  { %s4728_s22 = smov 0   ;;  %s4730_s23 = smov 0  }
   0xa LB: > { %5865 = sst [smem:[#allocation13_spill]] %s4669_s21  ;;  %s5829_s24 = sadd.s32 4294967295, %s4677_s23   ;;  %s4677_s23 = sphi %s4730_s23, %s20_s23   ;;  %s4673_s22 = sphi %s4728_s22, %s5978_s22   ;;  %s4669_s21 = sphi %s4726_s21, %s5977_s21   ;;  %s4665_s20 = sphi %s4724_s20, %s5976_s20   ;;  %s4661_s19 = sphi %s4722_s19, %s5975_s19   ;;  %s4657_s18 = sphi %s4720_s18, %s5974_s18  }
   0xb   : > { %p111_p0 = scmp.ne.s32.totalorder %s4665_s20, %s4661_s19  ;;  %p112_p1 = scmp.eq.s32.totalorder %s4677_s23, 0 }
   0xc   : > { %p117_p2 = scmp.ne.s32.totalorder %s4661_s19, %s4657_s18  ;;  %p4756_p3 = scmp.eq.s32.totalorder %s5829_s24, 0 }
   0xd   : > { %p113_p4 = por %p112_p1, %p111_p0  ;;  %p3994_p5 = scmp.ge.s32.totalorder %s4677_s23, 1 }
   0xe   : > { %s5866_s26 = scalar_select %p4756_p3, 1, 0 }
   0xf   : > { %p4763_p6 = por %p4756_p3, %p117_p2  ;;  %p182_p7 = scmp.lt.s32.totalorder %s4677_s23, 3 }
  0x10   : > { %s4679_s29 = smov [#allocation4]   ;;  %p4414_p10 = scmp.lt.s32.totalorder %s4677_s23, 2 }
  0x11   : > { %s5867_s27 = scalar_select %p4763_p6, 1, 0 }
  0x12   : > { %p4768_p8 = pnand %p3994_p5, %p182_p7  ;;  %s207_s30 = sshll.u32 %s4679_s29, 4  ;;  %s208_s30 = int_to_ptr.vmem [resolvable:$true] %s207_s30 }
  0x13   : > { %p4781_p12 = pnand %p4414_p10, %p113_p4  ;;  %s32_s8 = sadd.s32 1, %s4673_s22 }
  0x14   : > { %s5868_s28 = scalar_select %p4768_p8, 1, 0 }
  0x15   : > { %p4394_p9 = pneg %p4768_p8  ;;  %s5871_s1 = sld [smem:[#allocation37_spill]] }
  0x16   : > { %s5870_s7 = scalar_select %p4781_p12, 1, 0 }
  0x17   : > { %p4777_p11 = pnand %p4394_p9, %p4756_p3 }
  0x19   : > { %s5869_s6 = scalar_select %p4777_p11, 1, 0 }
  0x1a   : > { %p4794_p0 = pneg %p4777_p11 }
  0x1b   : > { %s4475_s11 = scalar_lea.hbm %s5871_s1, 512 }
  0x1c   : > { %p4476_p13 = scmp.ne.s32.totalorder %s5871_s1, %s4475_s11  ;;  %p4482_p4 = scmp.lt.u32.totalorder %s4475_s11, %s5871_s1 }
  0x1e   : > { %p4478_p1 = pnand %p4794_p0, %p4476_p13 }
  0x20   : > { %p4479_p2 = pneg %p4478_p1 }
  0x22   : > { %p4484_p5 = pnand %p4482_p4, %p4479_p2 }
  0x24   : > { %4487 = shalt.err (!%p4484_p5)
}
  0x25   : > { %s4488_s17 = scalar_lea.vmem %s208_s30, 512  ;;  %p4496_p6 = scmp.lt.s32.totalorder %s208_s30, %s208_s30 }
  0x26   : > { %p4489_p7 = scmp.ne.s32.totalorder %s208_s30, %s4488_s17  ;;  %p4497_p3 = scmp.lt.s32.totalorder %s4488_s17, %s4488_s17 }
  0x28   : > { %p4491_p9 = pnand %p4489_p7, %p4794_p0  ;;  %p4498_p8 = por %p4497_p3, %p4496_p6 }
  0x2a   : > { %p4492_p10 = pneg %p4491_p9 }
  0x2c   : > { %p4499_p12 = pnand %p4498_p8, %p4492_p10 }
  0x2e   : > { %4502 = shalt.err (!%p4499_p12)
}
  0x2f   : > { %s5830_s18 = smov 128   ;;  %s5831_s29 = smov 8  }
  0x30   : > { %4400 = dma.hbm_to_vmem [thread:$0]  (!%p4777_p11), %s5871_s1, 512, %s208_s30, [#allocation5], %s5830_s18, %s5830_s18, %s5831_s29  }
  0x31   : > { %p34_p3 = scmp.ge.s32.totalorder %s32_s8, 2  ;;  %s232_s11 = sand.u32 1, %s4677_s23  }
  0x32   : > { %s234_s12 = sand.u32 1, %s4665_s20   ;;  %s5832_s16 = smul.u32 2560, %s4673_s22 }
  0x33   : > { %s5980_s8 = smov (%p34_p3, %s32_s8), 0  ;;  %s4374_s13 = smul.u32 640, %s234_s12 }
  0x34   : > { %5873 = sst [smem:[#allocation14_spill]] %s5980_s8  ;;  %s101_s15 = ssub.s32 %s4673_s22, %s5980_s8 }
  0x35   : > { %p102_p6 = scmp.eq.s32.totalorder %s101_s15, 0  ;;  %s5874_s3 = sld [smem:[#allocation38_spill]] }
  0x36   : > { %s236_s30 = scalar_lea.vmem [#allocation7], %s4374_s13  ;;  %s5875_s10 = sadd.s32 1, %s4665_s20 }
  0x37   : > { %s244_s9 = sshll.u32 %s236_s30, 4  ;;  %s4836_s29 = scalar_lea.sflag [#allocation8], %s232_s11  ;;  %s4834_s9 = int_to_ptr.vmem [resolvable:$true] %s244_s9 }
  0x38   : > { %s4832_s18 = scalar_select %p102_p6, %s4665_s20, %s5875_s10  }
  0x39   : > { %p5877_p12 = scmp.ne.s32.totalorder %s5870_s7, 0 }
  0x3a   : > { %5876 = sst [smem:[#allocation15_spill]] %s4832_s18 }
  0x3b   : > { %s4827_s25 = scalar_lea.hbm %s5874_s3, %s5832_s16  ;;  %p5837_p13 = pneg %p5877_p12 }
  0x3c   : > { %s4503_s15 = scalar_lea.hbm %s4827_s25, 10240  ;;  %s4508_s13 = scalar_lea.hbm %s5874_s3, 20480 }
  0x3d   : > { %p4504_p8 = scmp.ne.s32.totalorder %s4827_s25, %s4503_s15  ;;  %p4509_p4 = scmp.lt.u32.totalorder %s4827_s25, %s5874_s3 }
  0x3e   : > { %p4510_p5 = scmp.lt.u32.totalorder %s4508_s13, %s4503_s15  ;;  %p4512_p9 = scmp.lt.u32.totalorder %s4503_s15, %s4827_s25 }
  0x3f   : > { %p4506_p1 = pnand %p5837_p13, %p4504_p8 }
  0x40   : > { %p4511_p7 = por %p4510_p5, %p4509_p4 }
  0x41   : > { %p4507_p2 = pneg %p4506_p1 }
  0x42   : > { %p4513_p10 = por %p4512_p9, %p4511_p7 }
  0x44   : > { %p4514_p3 = pnand %p4513_p10, %p4507_p2 }
  0x46   : > { %4517 = shalt.err (!%p4514_p3)
}
  0x47   : > { %s4518_s11 = scalar_lea.vmem %s4834_s9, 10240  ;;  %s4682_s10 = smov [#allocation7]  }
  0x48   : > { %p4519_p6 = scmp.ne.s32.totalorder %s4834_s9, %s4518_s11  ;;  %s4523_s24 = sshll.u32 %s4682_s10, 4  ;;  %s4524_s24 = int_to_ptr.vmem [resolvable:$false] %s4523_s24 }
  0x49   : > { %s4525_s16 = scalar_lea.vmem %s4524_s24, 20480  ;;  %p4526_p11 = scmp.lt.s32.totalorder %s4834_s9, %s4524_s24 }
  0x4a   : > { %p4521_p8 = pnand %p4519_p6, %p5837_p13  ;;  %p4527_p4 = scmp.lt.s32.totalorder %s4525_s16, %s4518_s11 }
  0x4c   : > { %p4522_p1 = pneg %p4521_p8  ;;  %p4528_p5 = por %p4527_p4, %p4526_p11 }
  0x4e   : > { %p4529_p7 = pnand %p4528_p5, %p4522_p1 }
  0x50   : > { %4532 = shalt.err (!%p4529_p7)
}
  0x51   : > { %s5838_s15 = smov 5120   ;;  %s5839_s17 = smov 2560  }
  0x52   : > { %s4685_s13 = smov 160   ;;  %s4375_s30 = smul.u32 1280, %s234_s12 }
  0x53   : > { %4407 = dma.hbm_to_vmem [thread:$0]  (!%p5877_p12), %s4827_s25, 10240, %s4834_s9, %s4836_s29, %s5838_s15, %s5839_s17, %s4685_s13  }
  0x54   : > { %s4686_s11 = smov [#allocation2]   ;;  %s258_s24 = scalar_lea.vmem [#allocation9], %s4375_s30 }
  0x55   : > { %s194_s10 = sshll.u32 %s4686_s11, 4  ;;  %s266_s16 = sshll.u32 %s258_s24, 4  ;;  %s195_s10 = int_to_ptr.vmem [resolvable:$true] %s194_s10  ;;  %s4897_s16 = int_to_ptr.vmem [resolvable:$true] %s266_s16 }
  0x56   : > { %s4533_s8 = scalar_lea.hbm %s5818_s0, 256 }
  0x57   : > { %p4534_p11 = scmp.ne.s32.totalorder %s5818_s0, %s4533_s8  ;;  %p4540_p10 = scmp.lt.u32.totalorder %s4533_s8, %s5818_s0 }
  0x59   : > { %p4536_p2 = pnand %p4534_p11, %p4794_p0 }
  0x5b   : > { %p4537_p9 = pneg %p4536_p2 }
  0x5d   : > { %p4542_p3 = pnand %p4540_p10, %p4537_p9 }
  0x5f   : > { %4545 = shalt.err (!%p4542_p3)
}
  0x60   : > { %s4546_s12 = scalar_lea.vmem %s195_s10, 256  ;;  %p4554_p4 = scmp.lt.s32.totalorder %s195_s10, %s195_s10 }
  0x61   : > { %p4547_p6 = scmp.ne.s32.totalorder %s195_s10, %s4546_s12  ;;  %p4555_p5 = scmp.lt.s32.totalorder %s4546_s12, %s4546_s12 }
  0x63   : > { %p4549_p8 = pnand %p4547_p6, %p4794_p0  ;;  %p4556_p7 = por %p4555_p5, %p4554_p4 }
  0x65   : > { %p4550_p1 = pneg %p4549_p8 }
  0x67   : > { %p4557_p13 = pnand %p4556_p7, %p4550_p1 }
  0x69   : > { %4560 = shalt.err (!%p4557_p13)
}
  0x6a   : > { %p5878_p11 = scmp.ne.s32.totalorder %s5869_s6, 0  ;;  %s5879_s1 = smov 8  }
  0x6b   : > { %s5880_s3 = smov 128   ;;  %s5881_s8 = smul.u32 2560, %s4673_s22 }
  0x6c   : > { %4397 = dma.hbm_to_vmem [thread:$0]  (!%p5878_p11), %s5818_s0, 256, %s195_s10, [#allocation3], %s5880_s3, %s5880_s3, %s5879_s1  }
  0x6d   : > { %s4895_s30 = scalar_lea.hbm %s5822_s4, %s5881_s8  ;;  %s4687_s11 = smov [#allocation6]  }
  0x6e   : > { %s221_s24 = sshll.u32 %s4687_s11, 4  ;;  %s4561_s15 = scalar_lea.hbm %s5820_s2, 16  ;;  %s222_s24 = int_to_ptr.vmem [resolvable:$true] %s221_s24 }
  0x6f   : > { %p4562_p13 = scmp.ne.s32.totalorder %s5820_s2, %s4561_s15  ;;  %p4568_p10 = scmp.lt.u32.totalorder %s4561_s15, %s5820_s2 }
  0x71   : > { %p4564_p2 = pnand %p4562_p13, %p4794_p0 }
  0x73   : > { %p4565_p9 = pneg %p4564_p2 }
  0x75   : > { %p4570_p3 = pnand %p4568_p10, %p4565_p9 }
  0x77   : > { %4573 = shalt.err (!%p4570_p3)
}
  0x78   : > { %s4574_s3 = scalar_lea.vmem %s222_s24, 16  ;;  %s4581_s21 = scalar_lea.vmem %s222_s24, 32 }
  0x79   : > { %p4575_p6 = scmp.ne.s32.totalorder %s222_s24, %s4574_s3  ;;  %p4582_p4 = scmp.lt.s32.totalorder %s222_s24, %s222_s24 }
  0x7a   : > { %p4583_p5 = scmp.lt.s32.totalorder %s4581_s21, %s4574_s3 }
  0x7b   : > { %p4577_p8 = pnand %p4575_p6, %p4794_p0 }
  0x7c   : > { %p4584_p7 = por %p4583_p5, %p4582_p4 }
  0x7d   : > { %p4578_p1 = pneg %p4577_p8 }
  0x7f   : > { %p4585_p12 = pnand %p4584_p7, %p4578_p1 }
  0x81   : > { %4588 = shalt.err (!%p4585_p12)
}
  0x82   : > { %4403 = dma.hbm_to_vmem [thread:$0]  (!%p5878_p11), %s5820_s2, 16, %s222_s24, [#allocation5]  }
  0x83   : > { %s4589_s14 = scalar_lea.hbm %s4895_s30, 20480  ;;  %p5882_p13 = scmp.ne.s32.totalorder %s5870_s7, 0 }
  0x84   : > { %p4590_p0 = scmp.ne.s32.totalorder %s4895_s30, %s4589_s14  ;;  %s4594_s9 = scalar_lea.hbm %s5822_s4, 40960 }
  0x85   : > { %p5883_p2 = pneg %p5882_p13  ;;  %p4595_p12 = scmp.lt.u32.totalorder %s4895_s30, %s5822_s4 }
  0x86   : > { %p4596_p3 = scmp.lt.u32.totalorder %s4594_s9, %s4589_s14  ;;  %p4598_p8 = scmp.lt.u32.totalorder %s4589_s14, %s4895_s30 }
  0x87   : > { %p4592_p9 = pnand %p4590_p0, %p5883_p2 }
  0x88   : > { %p4597_p6 = por %p4596_p3, %p4595_p12 }
  0x89   : > { %p4593_p10 = pneg %p4592_p9 }
  0x8a   : > { %p4599_p1 = por %p4598_p8, %p4597_p6 }
  0x8c   : > { %p4600_p4 = pnand %p4599_p1, %p4593_p10 }
  0x8e   : > { %4603 = shalt.err (!%p4600_p4)
}
  0x8f   : > { %s4604_s24 = scalar_lea.vmem %s4897_s16, 20480  ;;  %p5884_p5 = pmov %p5883_p2 }
  0x90   : > { %p4605_p11 = scmp.ne.s32.totalorder %s4897_s16, %s4604_s24  ;;  %s4688_s25 = smov [#allocation9]  }
  0x91   : > { %s4609_s12 = sshll.u32 %s4688_s25, 4  ;;  %s4610_s12 = int_to_ptr.vmem [resolvable:$false] %s4609_s12 }
  0x92   : > { %p4607_p7 = pnand %p4605_p11, %p5884_p5  ;;  %s4611_s5 = scalar_lea.vmem %s4610_s12, 40960 }
  0x93   : > { %p4612_p2 = scmp.lt.s32.totalorder %s4897_s16, %s4610_s12  ;;  %p4613_p9 = scmp.lt.s32.totalorder %s4611_s5, %s4604_s24 }
  0x94   : > { %p4608_p0 = pneg %p4607_p7 }
  0x95   : > { %p4614_p12 = por %p4613_p9, %p4612_p2 }
  0x97   : > { %p4615_p3 = pnand %p4614_p12, %p4608_p0 }
  0x99   : > { %4618 = shalt.err (!%p4615_p3)
}
  0x9a   : > { %s5885_s10 = smov 2560   ;;  %s5886_s1 = smov 5120  }
  0x9b   : > { %4410 = dma.hbm_to_vmem [thread:$0]  (!%p5882_p13), %s4895_s30, 20480, %s4897_s16, %s4836_s29, %s5886_s1, %s5885_s10, %s4685_s13  }
  0x9c   : > { %p5887_p10 = scmp.ne.s32.totalorder %s5868_s28, 0 }
  0x9e   : > { %278 = sbr.rel (%p5887_p10) target bundleno = 1173 (0x495), region = 40 }
  0xa5   : > { %p5888_p6 = scmp.ne.s32.totalorder %s5866_s26, 0 }
  0xa7   : > { %4644 = dma.done.wait (%p5888_p6), [#allocation3], 256  }
  0xa8   : > { %4646 = vsyncadd (%p5888_p6), [#allocation3], 4294967040 }
  0xa9   : > { %4648 = dma.done.wait (%p5888_p6), [#allocation5], 528  }
  0xaa   : > { %4650 = vsyncadd (%p5888_p6), [#allocation5], 4294966768  ;;  %s5889_s7 = sadd.s32 4294967295, %s4677_s23   ;;  %s294_s28 = sand.u32 1, %s4661_s19  }
  0xab   : > { %s292_s29 = sand.u32 1, %s5889_s7   ;;  %s4376_s13 = smul.u32 640, %s294_s28 }
  0xac   : > { %s293_s16 = scalar_lea.sflag [#allocation8], %s292_s29  ;;  %p5890_p13 = scmp.ne.s32.totalorder %s5867_s27, 0 }
  0xad   : > { %s4959_s30 = scalar_lea.vmem [#allocation7], %s4376_s13 }
  0xae   : > { %4652 = dma.done.wait (%p5890_p13), %s293_s16, 30720  }
  0xaf   : > { %4654 = vsyncadd (%p5890_p13), %s293_s16, 4294936576  ;;  %vm360_vm0 = vcmask 261120   ;;  %v349_v0 = vld [vmem:[#allocation4] sm:$0xff]  ;;  %v350_v1 = vld [vmem:[#allocation4 + $0x8] sm:$0xff]  ;;  %v4689_v30 = vmov 0   ;;  %s4377_s26 = smul.u32 1280, %s294_s28 }
  0xb0   : > { %v351_v2 = vld [vmem:[#allocation4 + $0x10] sm:$0xff]  ;;  %v4292_v3 = vpack.c.bf16 %v350_v1, %v349_v0  ;;  %v352_v4 = vld [vmem:[#allocation4 + $0x18] sm:$0xff]  ;;  %v443_v7 = vld [vmem:[%s4959_s30] sm:$0xff]  ;;  %958 = vmatprep.mubr.bf16.mxu1 %v4689_v30  ;;  %s5970_s3 = sld [smem:[#allocation13_spill]]  ;;  %s5971_s14 = sld [smem:[#allocation39_spill]] }
  0xb1   : > { %v347_v5 = vld [vmem:[#allocation2] sm:$0xff]  ;;  %v4296_v6 = vpack.c.bf16 %v352_v4, %v351_v2  ;;  %v463_v8 = vld [vmem:[%s4959_s30 + $0xa0] sm:$0xff]  ;;  %v348_v14 = vld [vmem:[#allocation2 + $0x8] sm:$0xff]  ;;  %s5101_s27 = scalar_lea.vmem [#allocation9], %s4377_s26 }
  0xb2   : > { %4289 = vmatprep.mubr.msk.f32.mxu0 %vm360_vm0, %v347_v5  ;;  %v444_v9 = vld [vmem:[%s4959_s30 + $0x8] sm:$0xff]  ;;  %4293 = vmatprep.subr.bf16.mxu0 %v4292_v3  ;;  %v4011_v10 = vcombine.high %v443_v7, %v463_v8  ;;  %v4010_v11 = vcombine.low %v443_v7, %v463_v8  ;;  %v483_v16 = vld [vmem:[%s4959_s30 + $0x140] sm:$0xff]  ;;  %v445_v24 = vld [vmem:[%s4959_s30 + $0x10] sm:$0xff] }
  0xb3   : > { %v464_v12 = vld [vmem:[%s4959_s30 + $0xa8] sm:$0xff]  ;;  %4295 = vmatpush3.bf16.msra.mxu0 %v4292_v3  ;;  %v503_v17 = vld [vmem:[%s4959_s30 + $0x1e0] sm:$0xff]  ;;  %v465_v25 = vld [vmem:[%s4959_s30 + $0xb0] sm:$0xff] }
  0xb4   : > { %4297 = vmatprep.subr.bf16.mxu0 %v4296_v6  ;;  %926 = vmatprep.subr.bf16.mxu1 %v4011_v10  ;;  %v4013_v13 = vcombine.high %v444_v9, %v464_v12  ;;  %v4012_v15 = vcombine.low %v444_v9, %v464_v12  ;;  %v484_v18 = vld [vmem:[%s4959_s30 + $0x148] sm:$0xff]  ;;  %v4051_v19 = vcombine.high %v483_v16, %v503_v17  ;;  %v446_v26 = vld [vmem:[%s4959_s30 + $0x18] sm:$0xff]  ;;  %v485_v35 = vld [vmem:[%s4959_s30 + $0x150] sm:$0xff] }
  0xb5   : > { %927 = vmatpush1.bf16.msra.mxu1 %v4010_v11  ;;  %v504_v20 = vld [vmem:[%s4959_s30 + $0x1e8] sm:$0xff]  ;;  %v4050_v21 = vcombine.low %v483_v16, %v503_v17  ;;  %v4014_v27 = vcombine.low %v445_v24, %v465_v25  ;;  %v4015_v28 = vcombine.high %v445_v24, %v465_v25  ;;  %v466_v29 = vld [vmem:[%s4959_s30 + $0xb8] sm:$0xff]  ;;  %v505_v38 = vld [vmem:[%s4959_s30 + $0x1f0] sm:$0xff] }
  0xb6   : > { %v4052_v22 = vcombine.low %v484_v18, %v504_v20  ;;  %v4053_v23 = vcombine.high %v484_v18, %v504_v20  ;;  %928 = vmatprep.subr.bf16.mxu1 %v4051_v19  ;;  %v4016_v31 = vcombine.low %v446_v26, %v466_v29  ;;  %v4017_v32 = vcombine.high %v446_v26, %v466_v29  ;;  %v4007_v33 = vld [vmem:[#allocation6] ss:$0 sm:$0xff]  ;;  %v447_v45 = vld [vmem:[%s4959_s30 + $0x20] sm:$0xff]  ;;  %v448_v47 = vld [vmem:[%s4959_s30 + $0x28] sm:$0xff]  ;;  %p341_p8 = scmp.lt.s32.totalorder %s5970_s3, 1 }
  0xb7   : > { %4299 = vmatpush3.bf16.msra.mxu0 %v4296_v6  ;;  %v486_v39 = vld [vmem:[%s4959_s30 + $0x158] sm:$0xff]  ;;  %v4055_v43 = vcombine.high %v485_v35, %v505_v38  ;;  %v467_v46 = vld [vmem:[%s4959_s30 + $0xc0] sm:$0xff]  ;;  %v468_v48 = vld [vmem:[%s4959_s30 + $0xc8] sm:$0xff]  ;;  %v4054_v49 = vcombine.low %v485_v35, %v505_v38 }
  0xb8   : > { %969 = vmatprep.subr.bf16.mxu0 %v4013_v13  ;;  %v506_v40 = vld [vmem:[%s4959_s30 + $0x1f8] sm:$0xff]  ;;  %v4019_v51 = vcombine.high %v447_v45, %v467_v46  ;;  %v4021_v52 = vcombine.high %v448_v47, %v468_v48  ;;  %v487_v53 = vld [vmem:[%s4959_s30 + $0x160] sm:$0xff]  ;;  %v488_v55 = vld [vmem:[%s4959_s30 + $0x168] sm:$0xff]  ;;  %v4018_v57 = vcombine.low %v447_v45, %v467_v46  ;;  %v4020_v58 = vcombine.low %v448_v47, %v468_v48  ;;  %s5982_s3 = smov (!%p341_p8, %s5970_s3), 1 }
  0xb9   : > { %929 = vmatpush1.bf16.msra.mxu1 %v4050_v21  ;;  %v4057_v44 = vcombine.high %v486_v39, %v506_v40  ;;  %v4056_v50 = vcombine.low %v486_v39, %v506_v40  ;;  %v507_v54 = vld [vmem:[%s4959_s30 + $0x200] sm:$0xff]  ;;  %v508_v56 = vld [vmem:[%s4959_s30 + $0x208] sm:$0xff]  ;;  %v449_v61 = vld [vmem:[%s4959_s30 + $0x30] sm:$0xff]  ;;  %s4274_s21 = sshll.u32 %s5982_s3, 4 }
  0xba   : > { %4290 = vmatmul.mubr.msk.f32.vlgmr.msra.gmra.mrb[0].mxu0 %vm360_vm0, %v348_v14  ;;  %1012 = vmatprep.subr.bf16.mxu1 %v4015_v28  ;;  %v4059_v59 = vcombine.high %v487_v53, %v507_v54  ;;  %v4061_v60 = vcombine.high %v488_v55, %v508_v56  ;;  %v469_v62 = vld [vmem:[%s4959_s30 + $0xd0] sm:$0xff]  ;;  %v450_v63 = vld [vmem:[%s4959_s30 + $0x38] sm:$0xff]  ;;  %v4058_v1 = vcombine.low %v487_v53, %v507_v54  ;;  %v451_v13 = vld [vmem:[%s4959_s30 + $0x40] sm:$0xff]  ;;  %s345_s15 = scalar_lea.vmem %s5971_s14, %s4274_s21 }
  0xbb   : > { %970 = vmatpush1.bf16.msra.mxu0 %v4012_v15  ;;  %1001 = vmatprep.mubr.bf16.mxu0 %v4689_v30  ;;  %v470_v0 = vld [vmem:[%s4959_s30 + $0xd8] sm:$0xff]  ;;  %v4060_v2 = vcombine.low %v488_v55, %v508_v56  ;;  %v4023_v3 = vcombine.high %v449_v61, %v469_v62  ;;  %v489_v5 = vld [vmem:[%s4959_s30 + $0x170] sm:$0xff]  ;;  %v4022_v9 = vcombine.low %v449_v61, %v469_v62  ;;  %v471_v14 = vld [vmem:[%s4959_s30 + $0xe0] sm:$0xff] }
  0xbc   : > { %971 = vmatprep.subr.bf16.mxu0 %v4053_v23  ;;  %v4025_v4 = vcombine.high %v450_v63, %v470_v0  ;;  %v509_v6 = vld [vmem:[%s4959_s30 + $0x210] sm:$0xff]  ;;  %v490_v7 = vld [vmem:[%s4959_s30 + $0x178] sm:$0xff]  ;;  %v4024_v10 = vcombine.low %v450_v63, %v470_v0  ;;  %v452_v15 = vld [vmem:[%s4959_s30 + $0x48] sm:$0xff]  ;;  %v4027_v19 = vcombine.high %v451_v13, %v471_v14  ;;  %v4026_v25 = vcombine.low %v451_v13, %v471_v14 }
  0xbd   : > { %v510_v8 = vld [vmem:[%s4959_s30 + $0x218] sm:$0xff]  ;;  %v4063_v11 = vcombine.high %v489_v5, %v509_v6  ;;  %v472_v16 = vld [vmem:[%s4959_s30 + $0xe8] sm:$0xff]  ;;  %v4062_v17 = vcombine.low %v489_v5, %v509_v6  ;;  %v491_v21 = vld [vmem:[%s4959_s30 + $0x180] sm:$0xff] }
  0xbe   : > { %v4065_v12 = vcombine.high %v490_v7, %v510_v8  ;;  %v4064_v18 = vcombine.low %v490_v7, %v510_v8  ;;  %v4029_v20 = vcombine.high %v452_v15, %v472_v16  ;;  %v492_v23 = vld [vmem:[%s4959_s30 + $0x188] sm:$0xff]  ;;  %v4028_v26 = vcombine.low %v452_v15, %v472_v16  ;;  %v453_v29 = vld [vmem:[%s4959_s30 + $0x50] sm:$0xff]  ;;  %v494_v40 = vld [vmem:[%s4959_s30 + $0x198] sm:$0xff] }
  0xbf   : > { %972 = vmatpush1.bf16.msra.mxu0 %v4052_v22  ;;  %v511_v22 = vld [vmem:[%s4959_s30 + $0x220] sm:$0xff]  ;;  %v512_v24 = vld [vmem:[%s4959_s30 + $0x228] sm:$0xff]  ;;  %v493_v38 = vld [vmem:[%s4959_s30 + $0x190] sm:$0xff] }
  0xc0   : > { %1055 = vmatprep.subr.bf16.mxu0 %v4017_v32  ;;  %v4069_v28 = vcombine.high %v492_v23, %v512_v24  ;;  %v454_v32 = vld [vmem:[%s4959_s30 + $0x58] sm:$0xff]  ;;  %v4068_v35 = vcombine.low %v492_v23, %v512_v24  ;;  %v513_v39 = vld [vmem:[%s4959_s30 + $0x230] sm:$0xff]  ;;  %v455_v47 = vld [vmem:[%s4959_s30 + $0x60] sm:$0xff] }
  0xc1   : > { %v4071_v45 = vcombine.high %v493_v38, %v513_v39  ;;  %v475_v48 = vld [vmem:[%s4959_s30 + $0x100] sm:$0xff]  ;;  %v457_v63 = vld [vmem:[%s4959_s30 + $0x70] sm:$0xff] }
  0xc2   : > { %v4035_v53 = vcombine.high %v455_v47, %v475_v48  ;;  %v495_v55 = vld [vmem:[%s4959_s30 + $0x1a0] sm:$0xff]  ;;  %v477_v0 = vld [vmem:[%s4959_s30 + $0x110] sm:$0xff] }
  0xc3   : > { %v515_v56 = vld [vmem:[%s4959_s30 + $0x240] sm:$0xff]  ;;  %v4039_v5 = vcombine.high %v457_v63, %v477_v0  ;;  %v497_v7 = vld [vmem:[%s4959_s30 + $0x1b0] sm:$0xff] }
  0xc4   : > { %v4075_v61 = vcombine.high %v495_v55, %v515_v56  ;;  %v517_v8 = vld [vmem:[%s4959_s30 + $0x250] sm:$0xff]  ;;  %v459_v15 = vld [vmem:[%s4959_s30 + $0x80] sm:$0xff] }
  0xc5   : > { %v4079_v13 = vcombine.high %v497_v7, %v517_v8  ;;  %v479_v16 = vld [vmem:[%s4959_s30 + $0x120] sm:$0xff] }
  0xc6   : > { %v499_v23 = vld [vmem:[%s4959_s30 + $0x1c0] sm:$0xff] }
  0xc7   : > { %v519_v24 = vld [vmem:[%s4959_s30 + $0x260] sm:$0xff] }
 0x18d   : > { %v4291_v34 = vpop.f32.mrb[0].mxu0 }
 0x18e   : > { %v439_v36 = vadd.f32 %v4291_v34, %v4007_v33  ;;  %v433_v37 = vpop.f32.mrb[1].mxu0  ;;  %v4066_v34 = vcombine.low %v491_v21, %v511_v22 }
 0x18f   : > { %v434_v41 = vadd.f32 %v4007_v33, %v433_v37  ;;  %v474_v33 = vld [vmem:[%s4959_s30 + $0xf8] sm:$0xff] }
 0x190   : > { %v4033_v37 = vcombine.high %v454_v32, %v474_v33 }
 0x191   : > { %v4985_v42 = vpack.c.bf16 %v439_v36, %v434_v41  ;;  %v514_v41 = vld [vmem:[%s4959_s30 + $0x238] sm:$0xff] }
 0x192   : > { %v4073_v46 = vcombine.high %v494_v40, %v514_v41 }
 0x193   : > { %4090 = vmatmul.mubr.msk.bf16.vlgmr.msra.gmra.mrb[0].mxu1 %vm360_vm0, %v4985_v42  ;;  %4091 = vmatmul.mubr.msk.bf16.vlgmr.msra.gmra.mrb[4].mxu0 %vm360_vm0, %v4985_v42 }
 0x194   : > { %1013 = vmatpush1.bf16.msra.mxu1 %v4014_v27  ;;  %1056 = vmatpush1.bf16.msra.mxu0 %v4016_v31  ;;  %v4067_v27 = vcombine.high %v491_v21, %v511_v22  ;;  %v473_v31 = vld [vmem:[%s4959_s30 + $0xf0] sm:$0xff]  ;;  %v4043_v21 = vcombine.high %v459_v15, %v479_v16 }
 0x195   : > { %1014 = vmatprep.subr.bf16.mxu1 %v4055_v43  ;;  %1057 = vmatprep.subr.bf16.mxu0 %v4057_v44  ;;  %v4031_v36 = vcombine.high %v453_v29, %v473_v31  ;;  %v4030_v43 = vcombine.low %v453_v29, %v473_v31  ;;  %v4032_v44 = vcombine.low %v454_v32, %v474_v33  ;;  %v461_v32 = vld [vmem:[%s4959_s30 + $0x90] sm:$0xff] }
 0x196   : > { %1044 = vmatprep.mubr.bf16.mxu1 %v4689_v30  ;;  %1087 = vmatprep.mubr.bf16.mxu0 %v4689_v30  ;;  %v4083_v29 = vcombine.high %v499_v23, %v519_v24  ;;  %v481_v33 = vld [vmem:[%s4959_s30 + $0x130] sm:$0xff] }
 0x198   : > { %1015 = vmatpush1.bf16.msra.mxu1 %v4054_v49  ;;  %1058 = vmatpush1.bf16.msra.mxu0 %v4056_v50  ;;  %v456_v49 = vld [vmem:[%s4959_s30 + $0x68] sm:$0xff] }
 0x199   : > { %1098 = vmatprep.subr.bf16.mxu1 %v4019_v51  ;;  %1141 = vmatprep.subr.bf16.mxu0 %v4021_v52  ;;  %v476_v50 = vld [vmem:[%s4959_s30 + $0x108] sm:$0xff]  ;;  %v4070_v51 = vcombine.low %v493_v38, %v513_v39  ;;  %v4072_v52 = vcombine.low %v494_v40, %v514_v41  ;;  %v4047_v38 = vcombine.high %v461_v32, %v481_v33  ;;  %v501_v40 = vld [vmem:[%s4959_s30 + $0x1d0] sm:$0xff] }
 0x19a   : > { %v4037_v54 = vcombine.high %v456_v49, %v476_v50  ;;  %v521_v41 = vld [vmem:[%s4959_s30 + $0x270] sm:$0xff] }
 0x19b   : > { %4092 = vmatmul.mubr.msk.bf16.vlgmr.msra.gmra.mrb[4].mxu1 %vm360_vm0, %v4985_v42  ;;  %4093 = vmatmul.mubr.msk.bf16.vlgmr.msra.gmra.mrb[8].mxu0 %vm360_vm0, %v4985_v42 }
 0x19c   : > { %1099 = vmatpush1.bf16.msra.mxu1 %v4018_v57  ;;  %1142 = vmatpush1.bf16.msra.mxu0 %v4020_v58  ;;  %v496_v57 = vld [vmem:[%s4959_s30 + $0x1a8] sm:$0xff] }
 0x19d   : > { %1100 = vmatprep.subr.bf16.mxu1 %v4059_v59  ;;  %1143 = vmatprep.subr.bf16.mxu0 %v4061_v60  ;;  %v516_v58 = vld [vmem:[%s4959_s30 + $0x248] sm:$0xff]  ;;  %v4034_v59 = vcombine.low %v455_v47, %v475_v48  ;;  %v4036_v60 = vcombine.low %v456_v49, %v476_v50  ;;  %v4087_v47 = vcombine.high %v501_v40, %v521_v41  ;;  %v2066_v49 = vld [vmem:[%s5101_s27] sm:$0xff] }
 0x19e   : > { %1130 = vmatprep.mubr.bf16.mxu1 %v4689_v30  ;;  %1173 = vmatprep.mubr.bf16.mxu0 %v4689_v30  ;;  %v4077_v62 = vcombine.high %v496_v57, %v516_v58  ;;  %v2086_v50 = vld [vmem:[%s5101_s27 + $0xa0] sm:$0xff] }
 0x1a0   : > { %1101 = vmatpush1.bf16.msra.mxu1 %v4058_v1  ;;  %1144 = vmatpush1.bf16.msra.mxu0 %v4060_v2  ;;  %v458_v1 = vld [vmem:[%s4959_s30 + $0x78] sm:$0xff] }
 0x1a1   : > { %1184 = vmatprep.subr.bf16.mxu1 %v4023_v3  ;;  %1227 = vmatprep.subr.bf16.mxu0 %v4025_v4  ;;  %v478_v2 = vld [vmem:[%s4959_s30 + $0x118] sm:$0xff]  ;;  %v4074_v3 = vcombine.low %v495_v55, %v515_v56  ;;  %v4076_v4 = vcombine.low %v496_v57, %v516_v58  ;;  %v2126_v55 = vld [vmem:[%s5101_s27 + $0x1e0] sm:$0xff]  ;;  %v4110_v56 = vcombine.low %v2066_v49, %v2086_v50 }
 0x1a2   : > { %v4041_v6 = vcombine.high %v458_v1, %v478_v2  ;;  %v2166_v58 = vld [vmem:[%s5101_s27 + $0x320] sm:$0xff] }
 0x1a3   : > { %4094 = vmatmul.mubr.msk.bf16.vlgmr.msra.gmra.mrb[8].mxu1 %vm360_vm0, %v4985_v42  ;;  %4095 = vmatmul.mubr.msk.bf16.vlgmr.msra.gmra.mrb[12].mxu0 %vm360_vm0, %v4985_v42 }
 0x1a4   : > { %1185 = vmatpush1.bf16.msra.mxu1 %v4022_v9  ;;  %1228 = vmatpush1.bf16.msra.mxu0 %v4024_v10  ;;  %v498_v9 = vld [vmem:[%s4959_s30 + $0x1b8] sm:$0xff] }
 0x1a5   : > { %1186 = vmatprep.subr.bf16.mxu1 %v4063_v11  ;;  %1229 = vmatprep.subr.bf16.mxu0 %v4065_v12  ;;  %v518_v10 = vld [vmem:[%s4959_s30 + $0x258] sm:$0xff]  ;;  %v4038_v11 = vcombine.low %v457_v63, %v477_v0  ;;  %v4040_v12 = vcombine.low %v458_v1, %v478_v2  ;;  %v5122_v0 = vld [vmem:[%s5101_s27 + $0x8] sm:$0xff] }
 0x1a6   : > { %1216 = vmatprep.mubr.bf16.mxu1 %v4689_v30  ;;  %1259 = vmatprep.mubr.bf16.mxu0 %v4689_v30  ;;  %v4081_v14 = vcombine.high %v498_v9, %v518_v10  ;;  %v5125_v1 = vld [vmem:[%s5101_s27 + $0xa8] sm:$0xff] }
 0x1a7   : > { %v4112_v2 = vcombine.low %v5122_v0, %v5125_v1 }
 0x1a8   : > { %1187 = vmatpush1.bf16.msra.mxu1 %v4062_v17  ;;  %1230 = vmatpush1.bf16.msra.mxu0 %v4064_v18  ;;  %v460_v17 = vld [vmem:[%s4959_s30 + $0x88] sm:$0xff] }
 0x1a9   : > { %1270 = vmatprep.subr.bf16.mxu1 %v4027_v19  ;;  %1313 = vmatprep.subr.bf16.mxu0 %v4029_v20  ;;  %v480_v18 = vld [vmem:[%s4959_s30 + $0x128] sm:$0xff]  ;;  %v4078_v19 = vcombine.low %v497_v7, %v517_v8  ;;  %v4080_v20 = vcombine.low %v498_v9, %v518_v10  ;;  %v2116_v9 = vld [vmem:[%s5101_s27 + $0x190] sm:$0xff] }
 0x1aa   : > { %v4045_v22 = vcombine.high %v460_v17, %v480_v18  ;;  %v2136_v10 = vld [vmem:[%s5101_s27 + $0x230] sm:$0xff] }
 0x1ab   : > { %4096 = vmatmul.mubr.msk.bf16.vlgmr.msra.gmra.mrb[12].mxu1 %vm360_vm0, %v4985_v42  ;;  %4097 = vmatmul.mubr.msk.bf16.vlgmr.msra.gmra.mrb[16].mxu0 %vm360_vm0, %v4985_v42 }
 0x1ac   : > { %1271 = vmatpush1.bf16.msra.mxu1 %v4026_v25  ;;  %1314 = vmatpush1.bf16.msra.mxu0 %v4028_v26  ;;  %v500_v25 = vld [vmem:[%s4959_s30 + $0x1c8] sm:$0xff] }
 0x1ad   : > { %1272 = vmatprep.subr.bf16.mxu1 %v4067_v27  ;;  %1315 = vmatprep.subr.bf16.mxu0 %v4069_v28  ;;  %v520_v26 = vld [vmem:[%s4959_s30 + $0x268] sm:$0xff]  ;;  %v4042_v27 = vcombine.low %v459_v15, %v479_v16  ;;  %v4044_v28 = vcombine.low %v460_v17, %v480_v18  ;;  %v2196_v17 = vld [vmem:[%s5101_s27 + $0x410] sm:$0xff] }
 0x1ae   : > { %1302 = vmatprep.mubr.bf16.mxu1 %v4689_v30  ;;  %1345 = vmatprep.mubr.bf16.mxu0 %v4689_v30  ;;  %v4085_v31 = vcombine.high %v500_v25, %v520_v26  ;;  %v2216_v18 = vld [vmem:[%s5101_s27 + $0x4b0] sm:$0xff] }
 0x1b0   : > { %1273 = vmatpush1.bf16.msra.mxu1 %v4066_v34  ;;  %1316 = vmatpush1.bf16.msra.mxu0 %v4068_v35  ;;  %v462_v34 = vld [vmem:[%s4959_s30 + $0x98] sm:$0xff] }
 0x1b1   : > { %1356 = vmatprep.subr.bf16.mxu1 %v4031_v36  ;;  %1399 = vmatprep.subr.bf16.mxu0 %v4033_v37  ;;  %v482_v35 = vld [vmem:[%s4959_s30 + $0x138] sm:$0xff]  ;;  %v4082_v36 = vcombine.low %v499_v23, %v519_v24  ;;  %v4084_v37 = vcombine.low %v500_v25, %v520_v26 }
 0x1b2   : > { %v4049_v39 = vcombine.high %v462_v34, %v482_v35 }
 0x1b3   : > { %4098 = vmatmul.mubr.msk.bf16.vlgmr.msra.gmra.mrb[16].mxu1 %vm360_vm0, %v4985_v42  ;;  %4099 = vmatmul.mubr.msk.bf16.vlgmr.msra.gmra.mrb[20].mxu0 %vm360_vm0, %v4985_v42 }
 0x1b4   : > { %1357 = vmatpush1.bf16.msra.mxu1 %v4030_v43  ;;  %1400 = vmatpush1.bf16.msra.mxu0 %v4032_v44  ;;  %v502_v43 = vld [vmem:[%s4959_s30 + $0x1d8] sm:$0xff] }
 0x1b5   : > { %1358 = vmatprep.subr.bf16.mxu1 %v4071_v45  ;;  %1401 = vmatprep.subr.bf16.mxu0 %v4073_v46  ;;  %v522_v44 = vld [vmem:[%s4959_s30 + $0x278] sm:$0xff]  ;;  %v4046_v45 = vcombine.low %v461_v32, %v481_v33  ;;  %v4048_v46 = vcombine.low %v462_v34, %v482_v35 }
 0x1b6   : > { %1388 = vmatprep.mubr.bf16.mxu1 %v4689_v30  ;;  %1431 = vmatprep.mubr.bf16.mxu0 %v4689_v30  ;;  %v4089_v48 = vcombine.high %v502_v43, %v522_v44 }
 0x1b8   : > { %1359 = vmatpush1.bf16.msra.mxu1 %v4070_v51  ;;  %1402 = vmatpush1.bf16.msra.mxu0 %v4072_v52  ;;  %v4086_v51 = vcombine.low %v501_v40, %v521_v41  ;;  %v4088_v52 = vcombine.low %v502_v43, %v522_v44 }
 0x1b9   : > { %1442 = vmatprep.subr.bf16.mxu1 %v4035_v53  ;;  %1485 = vmatprep.subr.bf16.mxu0 %v4037_v54  ;;  %v4111_v53 = vcombine.high %v2066_v49, %v2086_v50  ;;  %v2106_v54 = vld [vmem:[%s5101_s27 + $0x140] sm:$0xff] }
 0x1ba   : > { %v4151_v57 = vcombine.high %v2106_v54, %v2126_v55 }
 0x1bb   : > { %4100 = vmatmul.mubr.msk.bf16.vlgmr.msra.gmra.mrb[20].mxu1 %vm360_vm0, %v4985_v42  ;;  %4101 = vmatmul.mubr.msk.bf16.vlgmr.msra.gmra.mrb[24].mxu0 %vm360_vm0, %v4985_v42 }
 0x1bc   : > { %1443 = vmatpush1.bf16.msra.mxu1 %v4034_v59  ;;  %1486 = vmatpush1.bf16.msra.mxu0 %v4036_v60  ;;  %v4150_v59 = vcombine.low %v2106_v54, %v2126_v55 }
 0x1bd   : > { %1444 = vmatprep.subr.bf16.mxu1 %v4075_v61  ;;  %1487 = vmatprep.subr.bf16.mxu0 %v4077_v62  ;;  %v2186_v61 = vld [vmem:[%s5101_s27 + $0x3c0] sm:$0xff] }
 0x1be   : > { %1474 = vmatprep.mubr.bf16.mxu1 %v4689_v30  ;;  %1517 = vmatprep.mubr.bf16.mxu0 %v4689_v30  ;;  %v2206_v62 = vld [vmem:[%s5101_s27 + $0x460] sm:$0xff] }
 0x1c0   : > { %1445 = vmatpush1.bf16.msra.mxu1 %v4074_v3  ;;  %1488 = vmatpush1.bf16.msra.mxu0 %v4076_v4  ;;  %v4230_v3 = vcombine.low %v2186_v61, %v2206_v62  ;;  %v4113_v4 = vcombine.high %v5122_v0, %v5125_v1 }
 0x1c1   : > { %1528 = vmatprep.subr.bf16.mxu1 %v4039_v5  ;;  %1571 = vmatprep.subr.bf16.mxu0 %v4041_v6  ;;  %v2076_v5 = vld [vmem:[%s5101_s27 + $0x50] sm:$0xff] }
 0x1c2   : > { %v2096_v6 = vld [vmem:[%s5101_s27 + $0xf0] sm:$0xff] }
 0x1c3   : > { %4102 = vmatmul.mubr.msk.bf16.vlgmr.msra.gmra.mrb[24].mxu1 %vm360_vm0, %v4985_v42  ;;  %4103 = vmatmul.mubr.msk.bf16.vlgmr.msra.gmra.mrb[28].mxu0 %vm360_vm0, %v4985_v42  ;;  %v4130_v7 = vcombine.low %v2076_v5, %v2096_v6  ;;  %v4131_v8 = vcombine.high %v2076_v5, %v2096_v6 }
 0x1c4   : > { %1529 = vmatpush1.bf16.msra.mxu1 %v4038_v11  ;;  %1572 = vmatpush1.bf16.msra.mxu0 %v4040_v12  ;;  %v4170_v11 = vcombine.low %v2116_v9, %v2136_v10  ;;  %v4171_v12 = vcombine.high %v2116_v9, %v2136_v10 }
 0x1c5   : > { %1530 = vmatprep.subr.bf16.mxu1 %v4079_v13  ;;  %1573 = vmatprep.subr.bf16.mxu0 %v4081_v14  ;;  %v2156_v13 = vld [vmem:[%s5101_s27 + $0x2d0] sm:$0xff] }
 0x1c6   : > { %1560 = vmatprep.mubr.bf16.mxu1 %v4689_v30  ;;  %1603 = vmatprep.mubr.bf16.mxu0 %v4689_v30  ;;  %v2176_v14 = vld [vmem:[%s5101_s27 + $0x370] sm:$0xff] }
 0x1c7   : > { %v4210_v15 = vcombine.low %v2156_v13, %v2176_v14  ;;  %v4211_v16 = vcombine.high %v2156_v13, %v2176_v14 }
 0x1c8   : > { %1531 = vmatpush1.bf16.msra.mxu1 %v4078_v19  ;;  %1574 = vmatpush1.bf16.msra.mxu0 %v4080_v20  ;;  %v4250_v19 = vcombine.low %v2196_v17, %v2216_v18  ;;  %v4251_v20 = vcombine.high %v2196_v17, %v2216_v18 }
 0x1c9   : > { %1614 = vmatprep.subr.bf16.mxu1 %v4043_v21  ;;  %1657 = vmatprep.subr.bf16.mxu0 %v4045_v22  ;;  %v5140_v21 = vld [vmem:[%s5101_s27 + $0x58] sm:$0xff] }
 0x1ca   : > { %v5143_v22 = vld [vmem:[%s5101_s27 + $0xf8] sm:$0xff] }
 0x1cb   : > { %4104 = vmatmul.mubr.msk.bf16.vlgmr.msra.gmra.mrb[28].mxu1 %vm360_vm0, %v4985_v42  ;;  %4105 = vmatmul.mubr.msk.bf16.vlgmr.msra.gmra.mrb[32].mxu0 %vm360_vm0, %v4985_v42  ;;  %v4133_v24 = vcombine.high %v5140_v21, %v5143_v22 }
 0x1cc   : > { %1615 = vmatpush1.bf16.msra.mxu1 %v4042_v27  ;;  %1658 = vmatpush1.bf16.msra.mxu0 %v4044_v28 }
 0x1cd   : > { %1616 = vmatprep.subr.bf16.mxu1 %v4083_v29  ;;  %1659 = vmatprep.subr.bf16.mxu0 %v4085_v31 }
 0x1ce   : > { %1646 = vmatprep.mubr.bf16.mxu1 %v4689_v30  ;;  %1689 = vmatprep.mubr.bf16.mxu0 %v4689_v30 }
 0x1d0   : > { %1617 = vmatpush1.bf16.msra.mxu1 %v4082_v36  ;;  %1660 = vmatpush1.bf16.msra.mxu0 %v4084_v37  ;;  %v5150_v37 = vld [vmem:[%s5101_s27 + $0x148] sm:$0xff] }
 0x1d1   : > { %1700 = vmatprep.subr.bf16.mxu1 %v4047_v38  ;;  %1743 = vmatprep.subr.bf16.mxu0 %v4049_v39 }
 0x1d3   : > { %4106 = vmatmul.mubr.msk.bf16.vlgmr.msra.gmra.mrb[32].mxu1 %vm360_vm0, %v4985_v42  ;;  %4107 = vmatmul.mubr.msk.bf16.vlgmr.msra.gmra.mrb[36].mxu0 %vm360_vm0, %v4985_v42 }
 0x1d4   : > { %1701 = vmatpush1.bf16.msra.mxu1 %v4046_v45  ;;  %1744 = vmatpush1.bf16.msra.mxu0 %v4048_v46  ;;  %v5155_v46 = vld [vmem:[%s5101_s27 + $0x1e8] sm:$0xff] }
 0x1d5   : > { %1702 = vmatprep.subr.bf16.mxu1 %v4087_v47  ;;  %1745 = vmatprep.subr.bf16.mxu0 %v4089_v48 }
 0x1d6   : > { %1732 = vmatprep.mubr.bf16.mxu1 %v4689_v30  ;;  %1775 = vmatprep.mubr.bf16.mxu0 %v4689_v30  ;;  %v2146_v30 = vld [vmem:[%s5101_s27 + $0x280] sm:$0xff] }
 0x1d7   : > { %v4191_v60 = vcombine.high %v2146_v30, %v2166_v58  ;;  %v4190_v63 = vcombine.low %v2146_v30, %v2166_v58  ;;  %v4153_v30 = vcombine.high %v5150_v37, %v5155_v46 }
 0x1d8   : > { %1703 = vmatpush1.bf16.msra.mxu1 %v4086_v51  ;;  %1746 = vmatpush1.bf16.msra.mxu0 %v4088_v52 }
 0x1d9   : > { %3026 = vmatprep.subr.bf16.mxu0 %v4111_v53  ;;  %3436 = vmatprep.subr.bf16.mxu1 %v4131_v8 }
 0x1db   : > { %4108 = vmatmul.mubr.msk.bf16.vlgmr.msra.gmra.mrb[36].mxu1 %vm360_vm0, %v4985_v42  ;;  %4109 = vmatmul.mubr.msk.bf16.vlgmr.msra.gmra.mrb[40].mxu0 %vm360_vm0, %v4985_v42  ;;  %v4231_v42 = vcombine.high %v2186_v61, %v2206_v62 }
 0x1e1   : > { %3027 = vmatpush1.bf16.xpose.msra.mxu0 %v4110_v56  ;;  %3437 = vmatpush1.bf16.xpose.msra.mxu1 %v4130_v7 }
 0x1e2   : > { %3028 = vmatprep.subr.bf16.mxu0 %v4151_v57  ;;  %3438 = vmatprep.subr.bf16.mxu1 %v4171_v12 }
 0x1e9   : > { %3029 = vmatpush1.bf16.xpose.msra.mxu0 %v4150_v59  ;;  %3439 = vmatpush1.bf16.xpose.msra.mxu1 %v4170_v11 }
 0x1ea   : > { %3030 = vmatprep.subr.bf16.mxu0 %v4191_v60  ;;  %3440 = vmatprep.subr.bf16.mxu1 %v4211_v16 }
 0x1f1   : > { %3031 = vmatpush1.bf16.xpose.msra.mxu0 %v4190_v63  ;;  %3441 = vmatpush1.bf16.xpose.msra.mxu1 %v4210_v15 }
 0x1f2   : > { %3032 = vmatprep.subr.bf16.mxu0 %v4231_v42  ;;  %3442 = vmatprep.subr.bf16.mxu1 %v4251_v20 }
 0x1f9   : > { %3033 = vmatpush1.bf16.xpose.msra.mxu0 %v4230_v3  ;;  %3443 = vmatpush1.bf16.xpose.msra.mxu1 %v4250_v19 }
 0x1fa   : > { %3067 = vmatprep.subr.bf16.mxu0 %v4113_v4  ;;  %3477 = vmatprep.subr.bf16.mxu1 %v4133_v24 }
 0x266   : > { %v960_v25 = vpop.f32.mrb[0].mxu1  ;;  %v1003_v26 = vpop.f32.mrb[4].mxu0 }
 0x267   : > { %vm1786_vm1 = vcmp.gt.f32.partialorder %v960_v25, 0.0  ;;  %v1866_v27 = vmul.f32 0.01, %v960_v25  ;;  %v1868_v28 = vmul.f32 0.01, %v1003_v26  ;;  %vm1788_vm2 = vcmp.gt.f32.partialorder %v1003_v26, 0.0 }
 0x268   : > { %v962_v29 = vpop.f32.mrb[1].mxu1  ;;  %v1005_v31 = vpop.f32.mrb[5].mxu0 }
 0x269   : > { %v1946_v32 = vsel %vm1786_vm1, %v960_v25, %v1866_v27  ;;  %v964_v33 = vpop.f32.mrb[2].mxu1  ;;  %v1007_v34 = vpop.f32.mrb[6].mxu0  ;;  %vm1787_vm3 = vcmp.gt.f32.partialorder %v962_v29, 0.0  ;;  %v1867_v35 = vmul.f32 0.01, %v962_v29  ;;  %v5152_v38 = vsel %vm1788_vm2, %v1003_v26, %v1868_v28  ;;  %v5189_v25 = vld [vmem:[%s5101_s27 + $0x288] sm:$0xff] }
 0x26a   : > { %vm1826_vm4 = vcmp.gt.f32.partialorder %v964_v33, 0.0  ;;  %v1906_v36 = vmul.f32 0.01, %v964_v33  ;;  %vm1789_vm5 = vcmp.gt.f32.partialorder %v1005_v31, 0.0  ;;  %vm1828_vm6 = vcmp.gt.f32.partialorder %v1007_v34, 0.0  ;;  %v966_v40 = vpop.f32.mrb[3].mxu1 }
 0x26b   : > { %v1908_v39 = vmul.f32 0.01, %v1007_v34  ;;  %v1009_v41 = vpop.f32.mrb[7].mxu0  ;;  %v1869_v43 = vmul.f32 0.01, %v1005_v31  ;;  %vm1827_vm7 = vcmp.gt.f32.partialorder %v966_v40, 0.0  ;;  %v1947_v58 = vsel %vm1787_vm3, %v962_v29, %v1867_v35 }
 0x26c   : > { %v1986_v44 = vsel %vm1826_vm4, %v964_v33, %v1906_v36  ;;  %v1907_v45 = vmul.f32 0.01, %v966_v40  ;;  %vm1829_vm8 = vcmp.gt.f32.partialorder %v1009_v41, 0.0  ;;  %v1909_v49 = vmul.f32 0.01, %v1009_v41  ;;  %v5192_v26 = vld [vmem:[%s5101_s27 + $0x328] sm:$0xff] }
 0x26d   : > { %v2026_v47 = vpack.c.bf16 %v1986_v44, %v1946_v32  ;;  %v5157_v48 = vsel %vm1828_vm6, %v1007_v34, %v1908_v39  ;;  %v1949_v59 = vsel %vm1789_vm5, %v1005_v31, %v1869_v43  ;;  %v4152_v33 = vcombine.low %v5150_v37, %v5155_v46 }
 0x26e   : > { %v2028_v50 = vpack.c.bf16 %v5157_v48, %v5152_v38  ;;  %v1987_v51 = vsel %vm1827_vm7, %v966_v40, %v1907_v45  ;;  %v1046_v52 = vpop.f32.mrb[4].mxu1  ;;  %v1089_v53 = vpop.f32.mrb[8].mxu0  ;;  %v1989_v54 = vsel %vm1829_vm8, %v1009_v41, %v1909_v49  ;;  %v4193_v36 = vcombine.high %v5189_v25, %v5192_v26  ;;  %v5343_v38 = vld [vmem:[%s5101_s27 + $0x198] sm:$0xff] }
 0x26f   : > { %vm1790_vm9 = vcmp.gt.f32.partialorder %v1046_v52, 0.0  ;;  %v1870_v55 = vmul.f32 0.01, %v1046_v52  ;;  %v1048_v56 = vpop.f32.mrb[5].mxu1  ;;  %v1091_v57 = vpop.f32.mrb[9].mxu0  ;;  %vm1792_vm10 = vcmp.gt.f32.partialorder %v1089_v53, 0.0  ;;  %v2027_v62 = vpack.c.bf16 %v1987_v51, %v1947_v58 }
 0x270   : > { %v1872_v60 = vmul.f32 0.01, %v1089_v53  ;;  %vm1791_vm11 = vcmp.gt.f32.partialorder %v1048_v56, 0.0  ;;  %v1871_v61 = vmul.f32 0.01, %v1048_v56  ;;  %v1050_v63 = vpop.f32.mrb[6].mxu1  ;;  %v2029_v3 = vpack.c.bf16 %v1989_v54, %v1949_v59 }
 0x271   : > { %v1093_v42 = vpop.f32.mrb[10].mxu0  ;;  %v5165_v4 = vsel %vm1790_vm9, %v1046_v52, %v1870_v55  ;;  %vm1793_vm12 = vcmp.gt.f32.partialorder %v1091_v57, 0.0  ;;  %vm1830_vm13 = vcmp.gt.f32.partialorder %v1050_v63, 0.0  ;;  %v1910_v5 = vmul.f32 0.01, %v1050_v63  ;;  %v1052_v6 = vpop.f32.mrb[7].mxu1  ;;  %3058 = vmatprep.mubr.bf16.mxu0 %v2027_v62 }
 0x272   : > { %v1095_v7 = vpop.f32.mrb[11].mxu0  ;;  %v1873_v8 = vmul.f32 0.01, %v1091_v57  ;;  %vm1832_vm14 = vcmp.gt.f32.partialorder %v1093_v42, 0.0  ;;  %v1912_v9 = vmul.f32 0.01, %v1093_v42  ;;  %3059 = vmatmul.mubr.bf16.vlgmr.msra.gmra.mrb[44].mxu0 %v2026_v47  ;;  %v5170_v13 = vsel %vm1792_vm10, %v1089_v53, %v1872_v60 }
 0x273   : > { %vm1831_vm15 = vcmp.gt.f32.partialorder %v1052_v6, 0.0  ;;  %v5167_v10 = vsel %vm1830_vm13, %v1050_v63, %v1910_v5  ;;  %v1911_v11 = vmul.f32 0.01, %v1052_v6  ;;  %vm1833_vm0 = vcmp.gt.f32.partialorder %v1095_v7, 0.0  ;;  %3068 = vmatpush1.bf16.xpose.msra.mxu0 %v4112_v2  ;;  %3099 = vmatprep.mubr.bf16.mxu0 %v2029_v3  ;;  %v5224_v59 = vld [vmem:[%s5101_s27 + $0x3c8] sm:$0xff] }
 0x274   : > { %v1913_v12 = vmul.f32 0.01, %v1095_v7  ;;  %v5174_v15 = vsel %vm1832_vm14, %v1093_v42, %v1912_v9  ;;  %v5180_v16 = vsel %vm1791_vm11, %v1048_v56, %v1871_v61  ;;  %3069 = vmatprep.subr.bf16.mxu0 %v4153_v30  ;;  %v5195_v0 = vsel %vm1793_vm12, %v1091_v57, %v1873_v8  ;;  %v5227_v60 = vld [vmem:[%s5101_s27 + $0x468] sm:$0xff] }
 0x275   : > { %v5184_v18 = vsel %vm1831_vm15, %v1052_v6, %v1911_v11  ;;  %v4192_v42 = vcombine.low %v5189_v25, %v5192_v26 }
 0x276   : > { %v5186_v19 = vsel %vm1833_vm0, %v1095_v7, %v1913_v12  ;;  %v1132_v20 = vpop.f32.mrb[8].mxu1  ;;  %v1175_v24 = vpop.f32.mrb[12].mxu0  ;;  %v2031_v29 = vpack.c.bf16 %v5184_v18, %v5180_v16  ;;  %v5294_v7 = vld [vmem:[%s5101_s27 + $0x330] sm:$0xff] }
 0x277   : > { %vm1794_vm1 = vcmp.gt.f32.partialorder %v1132_v20, 0.0  ;;  %v1874_v1 = vmul.f32 0.01, %v1132_v20  ;;  %v1876_v2 = vmul.f32 0.01, %v1175_v24  ;;  %vm1796_vm2 = vcmp.gt.f32.partialorder %v1175_v24, 0.0 }
 0x278   : > { %v1134_v27 = vpop.f32.mrb[9].mxu1  ;;  %v1177_v28 = vpop.f32.mrb[13].mxu0  ;;  %v5358_v16 = vld [vmem:[%s5101_s27 + $0x470] sm:$0xff] }
 0x279   : > { %v5201_v32 = vsel %vm1794_vm1, %v1132_v20, %v1874_v1  ;;  %v1136_v34 = vpop.f32.mrb[10].mxu1  ;;  %v1179_v35 = vpop.f32.mrb[14].mxu0  ;;  %vm1795_vm3 = vcmp.gt.f32.partialorder %v1134_v27, 0.0  ;;  %v1875_v39 = vmul.f32 0.01, %v1134_v27  ;;  %v5207_v41 = vsel %vm1796_vm2, %v1175_v24, %v1876_v2  ;;  %v5248_v1 = vld [vmem:[%s5101_s27 + $0x10] sm:$0xff] }
 0x27a   : > { %vm1834_vm4 = vcmp.gt.f32.partialorder %v1136_v34, 0.0  ;;  %v1914_v40 = vmul.f32 0.01, %v1136_v34  ;;  %vm1797_vm5 = vcmp.gt.f32.partialorder %v1177_v28, 0.0  ;;  %vm1836_vm6 = vcmp.gt.f32.partialorder %v1179_v35, 0.0  ;;  %v1138_v44 = vpop.f32.mrb[11].mxu1 }
 0x27b   : > { %v1916_v43 = vmul.f32 0.01, %v1179_v35  ;;  %v1181_v45 = vpop.f32.mrb[15].mxu0  ;;  %v1877_v47 = vmul.f32 0.01, %v1177_v28  ;;  %vm1835_vm7 = vcmp.gt.f32.partialorder %v1138_v44, 0.0  ;;  %3070 = vmatpush1.bf16.xpose.msra.mxu0 %v4152_v33  ;;  %v5230_v61 = vsel %vm1795_vm3, %v1134_v27, %v1875_v39 }
 0x27c   : > { %v5209_v49 = vsel %vm1834_vm4, %v1136_v34, %v1914_v40  ;;  %v1915_v37 = vmul.f32 0.01, %v1138_v44  ;;  %vm1837_vm8 = vcmp.gt.f32.partialorder %v1181_v45, 0.0  ;;  %v1917_v52 = vmul.f32 0.01, %v1181_v45  ;;  %3071 = vmatprep.subr.bf16.mxu0 %v4193_v36  ;;  %v5251_v2 = vld [vmem:[%s5101_s27 + $0xb0] sm:$0xff] }
 0x27d   : > { %v5213_v51 = vsel %vm1836_vm6, %v1179_v35, %v1916_v43  ;;  %v5233_v62 = vsel %vm1797_vm5, %v1177_v28, %v1877_v47  ;;  %v4233_v20 = vcombine.high %v5224_v59, %v5227_v60  ;;  %v5260_v35 = vld [vmem:[%s5101_s27 + $0x150] sm:$0xff] }
 0x27e   : > { %v5217_v54 = vsel %vm1835_vm7, %v1138_v44, %v1915_v37  ;;  %v1218_v55 = vpop.f32.mrb[12].mxu1  ;;  %v1261_v56 = vpop.f32.mrb[16].mxu0  ;;  %v5219_v57 = vsel %vm1837_vm8, %v1181_v45, %v1917_v52  ;;  %v5263_v36 = vld [vmem:[%s5101_s27 + $0x1f0] sm:$0xff]  ;;  %v4232_v44 = vcombine.low %v5224_v59, %v5227_v60  ;;  %v4114_v37 = vcombine.low %v5248_v1, %v5251_v2 }
 0x27f   : > { %v1220_v30 = vpop.f32.mrb[13].mxu1  ;;  %v5221_v58 = vpop.f32.mrb[17].mxu0  ;;  %v1878_v63 = vmul.f32 0.01, %v1218_v55  ;;  %vm1798_vm9 = vcmp.gt.f32.partialorder %v1218_v55, 0.0  ;;  %vm1800_vm10 = vcmp.gt.f32.partialorder %v1261_v56, 0.0  ;;  %v4115_v52 = vcombine.high %v5248_v1, %v5251_v2 }
 0x280   : > { %v1880_v3 = vmul.f32 0.01, %v1261_v56  ;;  %v1222_v5 = vpop.f32.mrb[14].mxu1  ;;  %v1265_v6 = vpop.f32.mrb[18].mxu0  ;;  %v1879_v28 = vmul.f32 0.01, %v1220_v30 }
 0x281   : > { %vm1838_vm11 = vcmp.gt.f32.partialorder %v1222_v5, 0.0  ;;  %v1918_v9 = vmul.f32 0.01, %v1222_v5  ;;  %v1224_v11 = vpop.f32.mrb[15].mxu1  ;;  %v1267_v12 = vpop.f32.mrb[19].mxu0  ;;  %vm1840_vm12 = vcmp.gt.f32.partialorder %v1265_v6, 0.0  ;;  %v5243_v25 = vsel %vm1798_vm9, %v1218_v55, %v1878_v63 }
 0x282   : > { %v1920_v24 = vmul.f32 0.01, %v1265_v6  ;;  %5891 = vst [vmem:[#allocation16_spill] sm:$0xff] %v5243_v25  ;;  %v5253_v27 = vsel %vm1800_vm10, %v1261_v56, %v1880_v3  ;;  %vm1799_vm13 = vcmp.gt.f32.partialorder %v1220_v30, 0.0  ;;  %v1919_v45 = vmul.f32 0.01, %v1224_v11 }
 0x283   : > { %v5245_v26 = vsel %vm1838_vm11, %v1222_v5, %v1918_v9  ;;  %5893 = vst [vmem:[#allocation18_spill] sm:$0xff] %v5253_v27  ;;  %3072 = vmatpush1.bf16.xpose.msra.mxu0 %v4192_v42  ;;  %v1881_v55 = vmul.f32 0.01, %v5221_v58  ;;  %vm1839_vm14 = vcmp.gt.f32.partialorder %v1224_v11, 0.0  ;;  %v5279_v59 = vsel %vm1799_vm13, %v1220_v30, %v1879_v28  ;;  %v5289_v33 = vld [vmem:[%s5101_s27 + $0x290] sm:$0xff]  ;;  %v5352_v1 = vld [vmem:[%s5101_s27 + $0x238] sm:$0xff] }
 0x284   : > { %5892 = vst [vmem:[#allocation17_spill] sm:$0xff] %v5245_v26  ;;  %v5257_v34 = vsel %vm1840_vm12, %v1265_v6, %v1920_v24  ;;  %3073 = vmatprep.subr.bf16.mxu0 %v4233_v20  ;;  %vm1801_vm0 = vcmp.gt.f32.partialorder %v5221_v58, 0.0  ;;  %vm1841_vm1 = vcmp.gt.f32.partialorder %v1267_v12, 0.0  ;;  %v1921_v6 = vmul.f32 0.01, %v1267_v12  ;;  %v5355_v2 = vld [vmem:[%s5101_s27 + $0x3d0] sm:$0xff] }
 0x285   : > { %5894 = vst [vmem:[#allocation19_spill] sm:$0xff] %v5257_v34  ;;  %v5282_v20 = vsel %vm1839_vm14, %v1224_v11, %v1919_v45 }
 0x286   : > { %v1304_v40 = vpop.f32.mrb[16].mxu1  ;;  %v1347_v43 = vpop.f32.mrb[20].mxu0  ;;  %v5303_v45 = vsel %vm1841_vm1, %v1267_v12, %v1921_v6 }
 0x287   : > { %v1882_v47 = vmul.f32 0.01, %v1304_v40  ;;  %vm1802_vm15 = vcmp.gt.f32.partialorder %v1304_v40, 0.0  ;;  %v1306_v56 = vpop.f32.mrb[17].mxu1  ;;  %v5274_v63 = vpop.f32.mrb[21].mxu0  ;;  %vm1804_vm2 = vcmp.gt.f32.partialorder %v1347_v43, 0.0 }
 0x288   : > { %v1884_v60 = vmul.f32 0.01, %v1347_v43  ;;  %v1308_v3 = vpop.f32.mrb[18].mxu1  ;;  %v1351_v5 = vpop.f32.mrb[22].mxu0  ;;  %v1883_v53 = vmul.f32 0.01, %v1306_v56 }
 0x289   : > { %vm1842_vm3 = vcmp.gt.f32.partialorder %v1308_v3, 0.0  ;;  %v1922_v9 = vmul.f32 0.01, %v1308_v3  ;;  %v5284_v24 = vsel %vm1802_vm15, %v1304_v40, %v1882_v47  ;;  %vm1844_vm4 = vcmp.gt.f32.partialorder %v1351_v5, 0.0  ;;  %v1310_v30 = vpop.f32.mrb[19].mxu1  ;;  %v5286_v28 = vpop.f32.mrb[23].mxu0 }
 0x28a   : > { %5895 = vst [vmem:[#allocation20_spill] sm:$0xff] %v5284_v24  ;;  %v1924_v39 = vmul.f32 0.01, %v1351_v5  ;;  %vm1843_vm5 = vcmp.gt.f32.partialorder %v1310_v30, 0.0  ;;  %v1923_v46 = vmul.f32 0.01, %v1310_v30  ;;  %v5296_v17 = vsel %vm1804_vm2, %v1347_v43, %v1884_v60 }
 0x28b   : > { %v5291_v8 = vsel %vm1842_vm3, %v1308_v3, %v1922_v9  ;;  %5897 = vst [vmem:[#allocation22_spill] sm:$0xff] %v5296_v17  ;;  %vm1803_vm6 = vcmp.gt.f32.partialorder %v1306_v56, 0.0  ;;  %3074 = vmatpush1.bf16.xpose.msra.mxu0 %v4232_v44  ;;  %5899 = vst [vmem:[#allocation24_spill] sm:$0xff] %v5303_v45 }
 0x28c   : > { %5896 = vst [vmem:[#allocation21_spill] sm:$0xff] %v5291_v8  ;;  %v5300_v40 = vsel %vm1844_vm4, %v1351_v5, %v1924_v39  ;;  %v5307_v3 = vsel %vm1843_vm5, %v1310_v30, %v1923_v46  ;;  %3108 = vmatprep.subr.bf16.mxu0 %v4115_v52  ;;  %v5318_v46 = vsel %vm1801_vm0, %v5221_v58, %v1881_v55 }
 0x28d   : > { %5898 = vst [vmem:[#allocation23_spill] sm:$0xff] %v5300_v40  ;;  %5900 = vst [vmem:[#allocation25_spill] sm:$0xff] %v5307_v3  ;;  %v5321_v52 = vsel %vm1803_vm6, %v1306_v56, %v1883_v53 }
 0x28e   : > { %v1390_v9 = vpop.f32.mrb[20].mxu1  ;;  %v1433_v31 = vpop.f32.mrb[24].mxu0  ;;  %5901 = vst [vmem:[#allocation26_spill] sm:$0xff] %v5318_v46  ;;  %5902 = vst [vmem:[#allocation27_spill] sm:$0xff] %v5321_v52  ;;  %v1925_v46 = vmul.f32 0.01, %v5286_v28 }
 0x28f   : > { %vm1806_vm7 = vcmp.gt.f32.partialorder %v1390_v9, 0.0  ;;  %v1886_v60 = vmul.f32 0.01, %v1390_v9  ;;  %v1392_v11 = vpop.f32.mrb[21].mxu1  ;;  %v1435_v39 = vpop.f32.mrb[25].mxu0  ;;  %vm1808_vm8 = vcmp.gt.f32.partialorder %v1433_v31, 0.0 }
 0x290   : > { %v1888_v5 = vmul.f32 0.01, %v1433_v31  ;;  %vm1807_vm9 = vcmp.gt.f32.partialorder %v1392_v11, 0.0  ;;  %v1887_v6 = vmul.f32 0.01, %v1392_v11  ;;  %v1394_v30 = vpop.f32.mrb[22].mxu1 }
 0x291   : > { %v1437_v47 = vpop.f32.mrb[26].mxu0  ;;  %v1966_v12 = vsel %vm1806_vm7, %v1390_v9, %v1886_v60  ;;  %vm1809_vm10 = vcmp.gt.f32.partialorder %v1435_v39, 0.0  ;;  %vm1846_vm11 = vcmp.gt.f32.partialorder %v1394_v30, 0.0  ;;  %v1926_v58 = vmul.f32 0.01, %v1394_v30  ;;  %v1396_v55 = vpop.f32.mrb[23].mxu1 }
 0x292   : > { %v1439_v53 = vpop.f32.mrb[27].mxu0  ;;  %v1889_v56 = vmul.f32 0.01, %v1435_v39  ;;  %vm1848_vm12 = vcmp.gt.f32.partialorder %v1437_v47, 0.0  ;;  %v1928_v44 = vmul.f32 0.01, %v1437_v47  ;;  %3100 = vmatmul.mubr.bf16.vlgmr.msra.gmra.mrb[44].mxu0 %v2028_v50  ;;  %v5332_v60 = vsel %vm1808_vm8, %v1433_v31, %v1888_v5 }
 0x293   : > { %vm1847_vm13 = vcmp.gt.f32.partialorder %v1396_v55, 0.0  ;;  %v2006_v43 = vsel %vm1846_vm11, %v1394_v30, %v1926_v58  ;;  %v1927_v23 = vmul.f32 0.01, %v1396_v55  ;;  %vm1849_vm14 = vcmp.gt.f32.partialorder %v1439_v53, 0.0  ;;  %3109 = vmatpush1.bf16.xpose.msra.mxu0 %v4114_v37  ;;  %3140 = vmatprep.mubr.bf16.mxu0 %v2031_v29 }
 0x294   : > { %v1929_v9 = vmul.f32 0.01, %v1439_v53  ;;  %v2046_v14 = vpack.c.bf16 %v2006_v43, %v1966_v12  ;;  %v5334_v42 = vsel %vm1848_vm12, %v1437_v47, %v1928_v44  ;;  %v1967_v48 = vsel %vm1807_vm9, %v1392_v11, %v1887_v6 }
 0x295   : > { %v2007_v31 = vsel %vm1847_vm13, %v1396_v55, %v1927_v23  ;;  %v5903_v44 = vcombine.high %v5260_v35, %v5263_v36  ;;  %v1969_v18 = vsel %vm1809_vm10, %v1435_v39, %v1889_v56  ;;  %v4173_v56 = vcombine.high %v5343_v38, %v5352_v1 }
 0x296   : > { %v2009_v5 = vsel %vm1849_vm14, %v1439_v53, %v1929_v9  ;;  %v1476_v43 = vpop.f32.mrb[24].mxu1  ;;  %v1519_v47 = vpop.f32.mrb[28].mxu0  ;;  %v2047_v12 = vpack.c.bf16 %v2007_v31, %v1967_v48  ;;  %v5375_v48 = vld [vmem:[%s5101_s27 + $0x378] sm:$0xff]  ;;  %v5904_v39 = vcombine.low %v5140_v21, %v5143_v22 }
 0x297   : > { %3110 = vmatprep.subr.bf16.mxu0 %v5903_v44  ;;  %vm1810_vm15 = vcmp.gt.f32.partialorder %v1476_v43, 0.0  ;;  %v1890_v29 = vmul.f32 0.01, %v1476_v43  ;;  %v1892_v23 = vmul.f32 0.01, %v1519_v47  ;;  %vm1812_vm0 = vcmp.gt.f32.partialorder %v1519_v47, 0.0 }
 0x298   : > { %v1478_v37 = vpop.f32.mrb[25].mxu1  ;;  %v1521_v11 = vpop.f32.mrb[29].mxu0  ;;  %v2049_v6 = vpack.c.bf16 %v2009_v5, %v1969_v18  ;;  %v5372_v44 = vld [vmem:[%s5101_s27 + $0x2d8] sm:$0xff]  ;;  %3468 = vmatprep.mubr.bf16.mxu1 %v2047_v12 }
 0x299   : > { %v5363_v58 = vsel %vm1810_vm15, %v1476_v43, %v1890_v29  ;;  %v1480_v55 = vpop.f32.mrb[26].mxu1  ;;  %v1523_v53 = vpop.f32.mrb[30].mxu0  ;;  %vm1811_vm1 = vcmp.gt.f32.partialorder %v1478_v37, 0.0  ;;  %v1891_v31 = vmul.f32 0.01, %v1478_v37  ;;  %v5378_v43 = vsel %vm1812_vm0, %v1519_v47, %v1892_v23  ;;  %3469 = vmatmul.mubr.bf16.vlgmr.msra.gmra.mrb[40].mxu1 %v2046_v14 }
 0x29a   : > { %vm1850_vm2 = vcmp.gt.f32.partialorder %v1480_v55, 0.0  ;;  %v1930_v5 = vmul.f32 0.01, %v1480_v55  ;;  %vm1813_vm3 = vcmp.gt.f32.partialorder %v1521_v11, 0.0  ;;  %vm1852_vm4 = vcmp.gt.f32.partialorder %v1523_v53, 0.0  ;;  %v1482_v29 = vpop.f32.mrb[27].mxu1  ;;  %3478 = vmatpush1.bf16.xpose.msra.mxu1 %v5904_v39  ;;  %3509 = vmatprep.mubr.bf16.mxu1 %v2049_v6 }
 0x29b   : > { %v1932_v18 = vmul.f32 0.01, %v1523_v53  ;;  %v1525_v50 = vpop.f32.mrb[31].mxu0  ;;  %v1893_v30 = vmul.f32 0.01, %v1521_v11  ;;  %vm1851_vm5 = vcmp.gt.f32.partialorder %v1482_v29, 0.0  ;;  %v5905_v14 = vcombine.low %v5260_v35, %v5263_v36  ;;  %3479 = vmatprep.subr.bf16.mxu1 %v4173_v56 }
 0x29c   : > { %v5380_v9 = vsel %vm1850_vm2, %v1480_v55, %v1930_v5  ;;  %v1931_v12 = vmul.f32 0.01, %v1482_v29  ;;  %vm1853_vm6 = vcmp.gt.f32.partialorder %v1525_v50, 0.0  ;;  %v1933_v17 = vmul.f32 0.01, %v1525_v50 }
 0x29d   : > { %v5387_v23 = vsel %vm1852_vm4, %v1523_v53, %v1932_v18  ;;  %3111 = vmatpush1.bf16.xpose.msra.mxu0 %v5905_v14  ;;  %v5906_v6 = vcombine.high %v5289_v33, %v5294_v7  ;;  %v5411_v14 = vsel %vm1813_vm3, %v1521_v11, %v1893_v30  ;;  %v5417_v53 = vld [vmem:[%s5101_s27 + $0xb8] sm:$0xff]  ;;  %v5908_v35 = vcombine.low %v5343_v38, %v5352_v1 }
 0x29e   : > { %v5394_v21 = vsel %vm1851_vm5, %v1482_v29, %v1931_v12  ;;  %v1562_v22 = vpop.f32.mrb[28].mxu1  ;;  %v1605_v39 = vpop.f32.mrb[32].mxu0  ;;  %v5403_v36 = vsel %vm1853_vm6, %v1525_v50, %v1933_v17  ;;  %v4213_v29 = vcombine.high %v5372_v44, %v5375_v48  ;;  %v5408_v12 = vsel %vm1811_vm1, %v1478_v37, %v1891_v31  ;;  %v5414_v50 = vld [vmem:[%s5101_s27 + $0x18] sm:$0xff] }
 0x29f   : > { %3112 = vmatprep.subr.bf16.mxu0 %v5906_v6  ;;  %vm1814_vm7 = vcmp.gt.f32.partialorder %v1562_v22, 0.0  ;;  %v1894_v56 = vmul.f32 0.01, %v1562_v22  ;;  %v1564_v5 = vpop.f32.mrb[29].mxu1  ;;  %v1607_v18 = vpop.f32.mrb[33].mxu0  ;;  %vm1816_vm8 = vcmp.gt.f32.partialorder %v1605_v39, 0.0 }
 0x2a0   : > { %v1896_v6 = vmul.f32 0.01, %v1605_v39  ;;  %vm1815_vm9 = vcmp.gt.f32.partialorder %v1564_v5, 0.0  ;;  %v1895_v55 = vmul.f32 0.01, %v1564_v5  ;;  %v1566_v47 = vpop.f32.mrb[30].mxu1 }
 0x2a1   : > { %v1609_v17 = vpop.f32.mrb[34].mxu0  ;;  %v5424_v31 = vsel %vm1814_vm7, %v1562_v22, %v1894_v56  ;;  %vm1817_vm10 = vcmp.gt.f32.partialorder %v1607_v18, 0.0  ;;  %vm1854_vm11 = vcmp.gt.f32.partialorder %v1566_v47, 0.0  ;;  %v1934_v11 = vmul.f32 0.01, %v1566_v47  ;;  %v1568_v30 = vpop.f32.mrb[31].mxu1 }
 0x2a2   : > { %5907 = vst [vmem:[#allocation28_spill] sm:$0xff] %v5424_v31  ;;  %v1611_v40 = vpop.f32.mrb[35].mxu0  ;;  %v1897_v24 = vmul.f32 0.01, %v1607_v18  ;;  %vm1856_vm12 = vcmp.gt.f32.partialorder %v1609_v17, 0.0  ;;  %vm1855_vm13 = vcmp.gt.f32.partialorder %v1568_v30, 0.0  ;;  %3480 = vmatpush1.bf16.xpose.msra.mxu1 %v5908_v35  ;;  %v5432_v56 = vsel %vm1816_vm8, %v1605_v39, %v1896_v6 }
 0x2a3   : > { %v1936_v8 = vmul.f32 0.01, %v1609_v17  ;;  %v5426_v52 = vsel %vm1854_vm11, %v1566_v47, %v1934_v11  ;;  %v1935_v37 = vmul.f32 0.01, %v1568_v30  ;;  %vm1857_vm14 = vcmp.gt.f32.partialorder %v1611_v40, 0.0  ;;  %5909 = vst [vmem:[#allocation29_spill] sm:$0xff] %v5432_v56  ;;  %3481 = vmatprep.subr.bf16.mxu1 %v4213_v29 }
 0x2a4   : > { %v1937_v22 = vmul.f32 0.01, %v1611_v40  ;;  %v5911_v47 = vcombine.low %v5289_v33, %v5294_v7  ;;  %v5442_v38 = vld [vmem:[%s5101_s27 + $0x418] sm:$0xff]  ;;  %v4117_v7 = vcombine.high %v5414_v50, %v5417_v53  ;;  %vm1845_vm2 = vcmp.gt.f32.partialorder %v5286_v28, 0.0 }
 0x2a5   : > { %v5436_v27 = vsel %vm1856_vm12, %v1609_v17, %v1936_v8  ;;  %v5446_v35 = vsel %vm1855_vm13, %v1568_v30, %v1935_v37  ;;  %v5913_v8 = vcombine.high %v5355_v2, %v5358_v16  ;;  %v5456_v33 = vld [vmem:[%s5101_s27 + $0x4b8] sm:$0xff]  ;;  %v5465_v37 = vsel %vm1815_vm9, %v1564_v5, %v1895_v55 }
 0x2a6   : > { %5910 = vst [vmem:[#allocation30_spill] sm:$0xff] %v5436_v27  ;;  %3113 = vmatpush1.bf16.xpose.msra.mxu0 %v5911_v47  ;;  %v5448_v39 = vsel %vm1857_vm14, %v1611_v40, %v1937_v22  ;;  %v1648_v6 = vpop.f32.mrb[32].mxu1  ;;  %v1691_v11 = vpop.f32.mrb[36].mxu0  ;;  %v5459_v29 = vld [vmem:[%s5101_s27 + $0x158] sm:$0xff]  ;;  %v5468_v40 = vsel %vm1817_vm10, %v1607_v18, %v1897_v24  ;;  %v5473_v47 = vld [vmem:[%s5101_s27 + $0x60] sm:$0xff]  ;;  %v4252_v22 = vcombine.low %v5442_v38, %v5456_v33  ;;  %vm1805_vm4 = vcmp.gt.f32.partialorder %v5274_v63, 0.0 }
 0x2a7   : > { %5912 = vst [vmem:[#allocation31_spill] sm:$0xff] %v5448_v39  ;;  %3114 = vmatprep.subr.bf16.mxu0 %v5913_v8  ;;  %v5462_v17 = vld [vmem:[%s5101_s27 + $0x1f8] sm:$0xff]  ;;  %5914 = vst [vmem:[#allocation32_spill] sm:$0xff] %v5468_v40  ;;  %v1898_v30 = vmul.f32 0.01, %v1648_v6  ;;  %v5476_v8 = vld [vmem:[%s5101_s27 + $0x100] sm:$0xff]  ;;  %v4253_v56 = vcombine.high %v5442_v38, %v5456_v33  ;;  %v5918_v55 = vcombine.low %v5372_v44, %v5375_v48 }
 0x2a8   : > { %vm1818_vm15 = vcmp.gt.f32.partialorder %v1648_v6, 0.0  ;;  %v1900_v1 = vmul.f32 0.01, %v1691_v11  ;;  %v1650_v3 = vpop.f32.mrb[33].mxu1  ;;  %v5478_v34 = vpop.f32.mrb[37].mxu0  ;;  %vm1820_vm0 = vcmp.gt.f32.partialorder %v1691_v11, 0.0  ;;  %v5920_v39 = vcombine.low %v5355_v2, %v5358_v16 }
 0x2a9   : > { %v1652_v5 = vpop.f32.mrb[34].mxu1  ;;  %v1695_v18 = vpop.f32.mrb[38].mxu0  ;;  %v5495_v24 = vsel %vm1818_vm15, %v1648_v6, %v1898_v30  ;;  %vm1819_vm5 = vcmp.gt.f32.partialorder %v1650_v3, 0.0  ;;  %v1899_v33 = vmul.f32 0.01, %v1650_v3  ;;  %vm1821_vm8 = vcmp.gt.f32.partialorder %v5478_v34, 0.0 }
 0x2aa   : > { %vm1858_vm1 = vcmp.gt.f32.partialorder %v1652_v5, 0.0  ;;  %v1938_v45 = vmul.f32 0.01, %v1652_v5  ;;  %5915 = vst [vmem:[#allocation33_spill] sm:$0xff] %v5495_v24  ;;  %vm1860_vm3 = vcmp.gt.f32.partialorder %v1695_v18, 0.0  ;;  %v1654_v26 = vpop.f32.mrb[35].mxu1  ;;  %v5499_v38 = vsel %vm1820_vm0, %v1691_v11, %v1900_v1  ;;  %3482 = vmatpush1.bf16.xpose.msra.mxu1 %v5918_v55 }
 0x2ab   : > { %v1940_v25 = vmul.f32 0.01, %v1695_v18  ;;  %v1697_v40 = vpop.f32.mrb[39].mxu0  ;;  %5916 = vst [vmem:[#allocation34_spill] sm:$0xff] %v5499_v38  ;;  %v1939_v31 = vmul.f32 0.01, %v1654_v26  ;;  %3483 = vmatprep.subr.bf16.mxu1 %v4253_v56 }
 0x2ac   : > { %v5501_v27 = vsel %vm1858_vm1, %v1652_v5, %v1938_v45  ;;  %v1941_v1 = vmul.f32 0.01, %v1697_v40  ;;  %v1885_v11 = vmul.f32 0.01, %v5274_v63  ;;  %vm1859_vm6 = vcmp.gt.f32.partialorder %v1654_v26, 0.0 }
 0x2ad   : > { %5917 = vst [vmem:[#allocation35_spill] sm:$0xff] %v5501_v27  ;;  %v5508_v30 = vsel %vm1860_vm3, %v1695_v18, %v1940_v25  ;;  %vm1861_vm7 = vcmp.gt.f32.partialorder %v1697_v40, 0.0  ;;  %v5519_v25 = vsel %vm1845_vm2, %v5286_v28, %v1925_v46  ;;  %v1901_v55 = vmul.f32 0.01, %v5478_v34 }
 0x2ae   : > { %5919 = vst [vmem:[#allocation36_spill] sm:$0xff] %v5508_v30  ;;  %3115 = vmatpush1.bf16.xpose.msra.mxu0 %v5920_v39  ;;  %v1734_v44 = vpop.f32.mrb[36].mxu1  ;;  %v1777_v48 = vpop.f32.mrb[40].mxu0  ;;  %v5523_v39 = vsel %vm1819_vm5, %v1650_v3, %v1899_v33  ;;  %v5526_v18 = vsel %vm1859_vm6, %v1654_v26, %v1939_v31  ;;  %v5921_v26 = vpack.c.bf16 %v5167_v10, %v5165_v4  ;;  %vm3850_vm1 = vcmask 523264  }
 0x2af   : > { %3149 = vmatprep.subr.bf16.mxu0 %v4117_v7  ;;  %vm1822_vm9 = vcmp.gt.f32.partialorder %v1734_v44, 0.0  ;;  %v1902_v2 = vmul.f32 0.01, %v1734_v44  ;;  %v1736_v16 = vpop.f32.mrb[37].mxu1  ;;  %v1779_v56 = vpop.f32.mrb[41].mxu0  ;;  %vm1824_vm10 = vcmp.gt.f32.partialorder %v1777_v48, 0.0  ;;  %v5528_v7 = vsel %vm1861_vm7, %v1697_v40, %v1941_v1 }
 0x2b0   : > { %v1904_v5 = vmul.f32 0.01, %v1777_v48  ;;  %v1903_v45 = vmul.f32 0.01, %v1736_v16  ;;  %v1905_v28 = vmul.f32 0.01, %v1779_v56  ;;  %v5922_v4 = vcombine.low %v5414_v50, %v5417_v53 }
 0x2b1   : > { %v1738_v46 = vpop.f32.mrb[38].mxu1  ;;  %v1781_v6 = vpop.f32.mrb[42].mxu0  ;;  %v5530_v38 = vsel %vm1822_vm9, %v1734_v44, %v1902_v2  ;;  %vm1823_vm11 = vcmp.gt.f32.partialorder %v1736_v16, 0.0  ;;  %vm1825_vm0 = vcmp.gt.f32.partialorder %v1779_v56, 0.0  ;;  %v5923_v10 = vpack.c.bf16 %v5186_v19, %v5195_v0  ;;  %v2118_v19 = vld [vmem:[%s5101_s27 + $0x1a0] sm:$0xff] }
 0x2b2   : > { %vm1862_vm12 = vcmp.gt.f32.partialorder %v1738_v46, 0.0  ;;  %v1942_v30 = vmul.f32 0.01, %v1738_v46  ;;  %v1740_v24 = vpop.f32.mrb[39].mxu1  ;;  %v1783_v3 = vpop.f32.mrb[43].mxu0  ;;  %v5532_v33 = vsel %vm1824_vm10, %v1777_v48, %v1904_v5  ;;  %vm1864_vm13 = vcmp.gt.f32.partialorder %v1781_v6, 0.0  ;;  %3484 = vmatpush1.bf16.xpose.msra.mxu1 %v4252_v22 }
 0x2b3   : > { %v1944_v27 = vmul.f32 0.01, %v1781_v6  ;;  %vm1863_vm14 = vcmp.gt.f32.partialorder %v1740_v24, 0.0  ;;  %v1943_v40 = vmul.f32 0.01, %v1740_v24  ;;  %vm1865_vm15 = vcmp.gt.f32.partialorder %v1783_v3, 0.0 }
 0x2b4   : > { %v5537_v31 = vsel %vm1862_vm12, %v1738_v46, %v1942_v30  ;;  %v1945_v1 = vmul.f32 0.01, %v1783_v3  ;;  %v2059_v22 = vpack.c.bf16 %v5526_v18, %v5523_v39  ;;  %v5925_v53 = vcombine.high %v5473_v47, %v5476_v8  ;;  %v2138_v0 = vld [vmem:[%s5101_s27 + $0x240] sm:$0xff]  ;;  %v2149_v46 = vld [vmem:[%s5101_s27 + $0x298] sm:$0xff] }
 0x2b5   : > { %3141 = vmatmul.mubr.bf16.vlgmr.msra.gmra.mrb[44].mxu0 %v5921_v26  ;;  %v2062_v44 = vpack.c.bf16 %v5537_v31, %v5530_v38  ;;  %v5541_v48 = vsel %vm1864_vm13, %v1781_v6, %v1944_v27  ;;  %v5553_v2 = vsel %vm1863_vm14, %v1740_v24, %v1943_v40  ;;  %v5924_v27 = vcombine.high %v5459_v29, %v5462_v17  ;;  %v2202_v39 = vld [vmem:[%s5101_s27 + $0x440] sm:$0xff] }
 0x2b6   : > { %3150 = vmatpush1.bf16.xpose.msra.mxu0 %v5922_v4  ;;  %3181 = vmatprep.mubr.bf16.mxu0 %v5923_v10  ;;  %v2064_v30 = vpack.c.bf16 %v5541_v48, %v5532_v33  ;;  %v5555_v5 = vsel %vm1865_vm15, %v1783_v3, %v1945_v1  ;;  %v5568_v50 = vsel %vm1805_vm4, %v5274_v63, %v1885_v11  ;;  %v2169_v3 = vld [vmem:[%s5101_s27 + $0x338] sm:$0xff]  ;;  %v2222_v18 = vld [vmem:[%s5101_s27 + $0x4e0] sm:$0xff] }
 0x2b7   : > { %3151 = vmatprep.subr.bf16.mxu0 %v5924_v27  ;;  %3518 = vmatprep.subr.bf16.mxu1 %v5925_v53  ;;  %v5573_v24 = vsel %vm1821_vm8, %v5478_v34, %v1901_v55  ;;  %v4134_v6 = vcombine.low %v5473_v47, %v5476_v8  ;;  %v5580_v26 = vsel %vm1823_vm11, %v1736_v16, %v1903_v45  ;;  %v2209_v1 = vld [vmem:[%s5101_s27 + $0x478] sm:$0xff]  ;;  %v2070_v27 = vld [vmem:[%s5101_s27 + $0x20] sm:$0xff] }
 0x2b8   : > { %v5583_v40 = vsel %vm1825_vm0, %v1779_v56, %v1905_v28  ;;  %v2061_v63 = vpack.c.bf16 %v5528_v7, %v5573_v24  ;;  %v2045_v34 = vpack.c.bf16 %v5519_v25, %v5568_v50  ;;  %v4156_v47 = vcombine.low %v5459_v29, %v5462_v17  ;;  %v2158_v29 = vld [vmem:[%s5101_s27 + $0x2e0] sm:$0xff]  ;;  %v2189_v28 = vld [vmem:[%s5101_s27 + $0x3d8] sm:$0xff]  ;;  %v2203_v7 = vld [vmem:[%s5101_s27 + $0x448] sm:$0xff] }
 0x2b9   : > { %v4175_v8 = vcombine.high %v2118_v19, %v2138_v0  ;;  %v2063_v11 = vpack.c.bf16 %v5553_v2, %v5580_v26  ;;  %v2065_v45 = vpack.c.bf16 %v5555_v5, %v5583_v40  ;;  %v4197_v16 = vcombine.high %v2149_v46, %v2169_v3  ;;  %v2178_v17 = vld [vmem:[%s5101_s27 + $0x380] sm:$0xff]  ;;  %v2223_v24 = vld [vmem:[%s5101_s27 + $0x4e8] sm:$0xff]  ;;  %v2164_v25 = vld [vmem:[%s5101_s27 + $0x310] sm:$0xff] }
 0x2ba   : > { %v5926_v56 = vpack.c.bf16 %v5334_v42, %v5332_v60  ;;  %v5927_v55 = vpack.c.bf16 %v5394_v21, %v5408_v12  ;;  %v4174_v4 = vcombine.low %v2118_v19, %v2138_v0  ;;  %v4196_v10 = vcombine.low %v2149_v46, %v2169_v3  ;;  %v2198_v21 = vld [vmem:[%s5101_s27 + $0x420] sm:$0xff]  ;;  %v2079_v46 = vld [vmem:[%s5101_s27 + $0x68] sm:$0xff]  ;;  %v2184_v50 = vld [vmem:[%s5101_s27 + $0x3b0] sm:$0xff] }
 0x2bb   : > { %v4215_v42 = vcombine.high %v2158_v29, %v2178_v17  ;;  %v4237_v60 = vcombine.high %v2189_v28, %v2209_v1  ;;  %v2218_v12 = vld [vmem:[%s5101_s27 + $0x4c0] sm:$0xff]  ;;  %v2099_v3 = vld [vmem:[%s5101_s27 + $0x108] sm:$0xff]  ;;  %v2204_v2 = vld [vmem:[%s5101_s27 + $0x450] sm:$0xff] }
 0x2bc   : > { %3510 = vmatmul.mubr.bf16.vlgmr.msra.gmra.mrb[40].mxu1 %v5926_v56  ;;  %v2090_v53 = vld [vmem:[%s5101_s27 + $0xc0] sm:$0xff]  ;;  %v4254_v56 = vcombine.low %v2198_v21, %v2218_v12  ;;  %v2224_v26 = vld [vmem:[%s5101_s27 + $0x4f0] sm:$0xff] }
 0x2bd   : > { %3519 = vmatpush1.bf16.xpose.msra.mxu1 %v4134_v6  ;;  %3550 = vmatprep.mubr.bf16.mxu1 %v5927_v55  ;;  %v4214_v6 = vcombine.low %v2158_v29, %v2178_v17  ;;  %v2110_v19 = vld [vmem:[%s5101_s27 + $0x160] sm:$0xff]  ;;  %v4118_v55 = vcombine.low %v2070_v27, %v2090_v53  ;;  %v5928_v29 = vpack.c.bf16 %v5174_v15, %v5170_v13 }
 0x2be   : > { %3152 = vmatpush1.bf16.xpose.msra.mxu0 %v4156_v47  ;;  %3520 = vmatprep.subr.bf16.mxu1 %v4175_v8  ;;  %v4236_v47 = vcombine.low %v2189_v28, %v2209_v1  ;;  %v4255_v8 = vcombine.high %v2198_v21, %v2218_v12  ;;  %v2130_v0 = vld [vmem:[%s5101_s27 + $0x200] sm:$0xff]  ;;  %v5929_v17 = vpack.c.bf16 %v5217_v54, %v5230_v61  ;;  %v2119_v28 = vld [vmem:[%s5101_s27 + $0x1a8] sm:$0xff] }
 0x2bf   : > { %3153 = vmatprep.subr.bf16.mxu0 %v4197_v16  ;;  %v4119_v16 = vcombine.high %v2070_v27, %v2090_v53  ;;  %v2139_v1 = vld [vmem:[%s5101_s27 + $0x248] sm:$0xff]  ;;  %v4136_v21 = vcombine.low %v2079_v46, %v2099_v3  ;;  %v4158_v12 = vcombine.low %v2110_v19, %v2130_v0  ;;  %v5930_v27 = vpack.c.bf16 %v5380_v9, %v5363_v58 }
 0x2c0   : > { %v4177_v13 = vcombine.high %v2119_v28, %v2139_v1  ;;  %v5931_v54 = vpack.c.bf16 %v5403_v36, %v5411_v14  ;;  %v2159_v61 = vld [vmem:[%s5101_s27 + $0x2e8] sm:$0xff] }
 0x2c1   : > { %v2179_v53 = vld [vmem:[%s5101_s27 + $0x388] sm:$0xff] }
 0x2c2   : > { %v4217_v58 = vcombine.high %v2159_v61, %v2179_v53  ;;  %v2199_v36 = vld [vmem:[%s5101_s27 + $0x428] sm:$0xff] }
 0x2c3   : > { %v2219_v14 = vld [vmem:[%s5101_s27 + $0x4c8] sm:$0xff] }
 0x2c5   : > { %3521 = vmatpush1.bf16.xpose.msra.mxu1 %v4174_v4  ;;  %v4159_v4 = vcombine.high %v2110_v19, %v2130_v0  ;;  %v2071_v19 = vld [vmem:[%s5101_s27 + $0x28] sm:$0xff] }
 0x2c6   : > { %3154 = vmatpush1.bf16.xpose.msra.mxu0 %v4196_v10  ;;  %3522 = vmatprep.subr.bf16.mxu1 %v4215_v42  ;;  %v4137_v10 = vcombine.high %v2079_v46, %v2099_v3  ;;  %v2150_v42 = vld [vmem:[%s5101_s27 + $0x2a0] sm:$0xff]  ;;  %v2091_v0 = vld [vmem:[%s5101_s27 + $0xc8] sm:$0xff]  ;;  %v4216_v46 = vcombine.low %v2159_v61, %v2179_v53 }
 0x2c7   : > { %3155 = vmatprep.subr.bf16.mxu0 %v4237_v60  ;;  %v2170_v60 = vld [vmem:[%s5101_s27 + $0x340] sm:$0xff] }
 0x2c8   : > { %v4199_v15 = vcombine.high %v2150_v42, %v2170_v60 }
 0x2cd   : > { %3523 = vmatpush1.bf16.xpose.msra.mxu1 %v4214_v6  ;;  %v2190_v6 = vld [vmem:[%s5101_s27 + $0x3e0] sm:$0xff] }
 0x2ce   : > { %3156 = vmatpush1.bf16.xpose.msra.mxu0 %v4236_v47  ;;  %3524 = vmatprep.subr.bf16.mxu1 %v4255_v8  ;;  %v2210_v47 = vld [vmem:[%s5101_s27 + $0x480] sm:$0xff]  ;;  %v4176_v8 = vcombine.low %v2119_v28, %v2139_v1  ;;  %v4256_v28 = vcombine.low %v2199_v36, %v2219_v14  ;;  %v4120_v1 = vcombine.low %v2071_v19, %v2091_v0 }
 0x2cf   : > { %3190 = vmatprep.subr.bf16.mxu0 %v4119_v16  ;;  %v4198_v16 = vcombine.low %v2150_v42, %v2170_v60  ;;  %v4239_v9 = vcombine.high %v2190_v6, %v2210_v47  ;;  %v4238_v3 = vcombine.low %v2190_v6, %v2210_v47  ;;  %v5934_v6 = vpack.c.bf16 %v5387_v23, %v5378_v43  ;;  %v2180_v47 = vld [vmem:[%s5101_s27 + $0x390] sm:$0xff] }
 0x2d5   : > { %3182 = vmatmul.mubr.bf16.vlgmr.msra.gmra.mrb[44].mxu0 %v5928_v29  ;;  %3525 = vmatpush1.bf16.xpose.msra.mxu1 %v4254_v56  ;;  %v4257_v56 = vcombine.high %v2199_v36, %v2219_v14  ;;  %v2080_v29 = vld [vmem:[%s5101_s27 + $0x70] sm:$0xff] }
 0x2d6   : > { %3191 = vmatpush1.bf16.xpose.msra.mxu0 %v4118_v55  ;;  %3222 = vmatprep.mubr.bf16.mxu0 %v5929_v17  ;;  %v4121_v55 = vcombine.high %v2071_v19, %v2091_v0  ;;  %v2100_v17 = vld [vmem:[%s5101_s27 + $0x110] sm:$0xff] }
 0x2d7   : > { %3192 = vmatprep.subr.bf16.mxu0 %v4159_v4  ;;  %3559 = vmatprep.subr.bf16.mxu1 %v4137_v10  ;;  %v2111_v4 = vld [vmem:[%s5101_s27 + $0x168] sm:$0xff]  ;;  %v4139_v60 = vcombine.high %v2080_v29, %v2100_v17  ;;  %v4138_v61 = vcombine.low %v2080_v29, %v2100_v17  ;;  %v2072_v36 = vld [vmem:[%s5101_s27 + $0x30] sm:$0xff] }
 0x2d8   : > { %v2131_v10 = vld [vmem:[%s5101_s27 + $0x208] sm:$0xff]  ;;  %v2092_v14 = vld [vmem:[%s5101_s27 + $0xd0] sm:$0xff] }
 0x2d9   : > { %v4161_v42 = vcombine.high %v2111_v4, %v2131_v10  ;;  %v4160_v53 = vcombine.low %v2111_v4, %v2131_v10  ;;  %v2081_v4 = vld [vmem:[%s5101_s27 + $0x78] sm:$0xff]  ;;  %v4122_v17 = vcombine.low %v2072_v36, %v2092_v14 }
 0x2da   : > { %v2101_v10 = vld [vmem:[%s5101_s27 + $0x118] sm:$0xff] }
 0x2dc   : > { %3551 = vmatmul.mubr.bf16.vlgmr.msra.gmra.mrb[40].mxu1 %v5930_v27  ;;  %v2151_v27 = vld [vmem:[%s5101_s27 + $0x2a8] sm:$0xff] }
 0x2dd   : > { %3560 = vmatpush1.bf16.xpose.msra.mxu1 %v4136_v21  ;;  %3591 = vmatprep.mubr.bf16.mxu1 %v5931_v54  ;;  %v5932_v21 = vpack.c.bf16 %v5209_v49, %v5201_v32  ;;  %v2171_v54 = vld [vmem:[%s5101_s27 + $0x348] sm:$0xff] }
 0x2de   : > { %3193 = vmatpush1.bf16.xpose.msra.mxu0 %v4158_v12  ;;  %3561 = vmatprep.subr.bf16.mxu1 %v4177_v13  ;;  %v5933_v12 = vpack.c.bf16 %v5219_v57, %v5233_v62  ;;  %v2120_v13 = vld [vmem:[%s5101_s27 + $0x1b0] sm:$0xff]  ;;  %v4201_v49 = vcombine.high %v2151_v27, %v2171_v54  ;;  %v5935_v57 = vpack.c.bf16 %v5446_v35, %v5465_v37 }
 0x2df   : > { %3194 = vmatprep.subr.bf16.mxu0 %v4199_v15  ;;  %v2140_v15 = vld [vmem:[%s5101_s27 + $0x250] sm:$0xff] }
 0x2e0   : > { %v4179_v32 = vcombine.high %v2120_v13, %v2140_v15  ;;  %v2160_v62 = vld [vmem:[%s5101_s27 + $0x2f0] sm:$0xff] }
 0x2e1   : > { %v4219_v43 = vcombine.high %v2160_v62, %v2180_v47  ;;  %v2200_v35 = vld [vmem:[%s5101_s27 + $0x430] sm:$0xff]  ;;  %v4218_v19 = vcombine.low %v2160_v62, %v2180_v47 }
 0x2e2   : > { %v2220_v37 = vld [vmem:[%s5101_s27 + $0x4d0] sm:$0xff] }
 0x2e3   : > { %v4258_v29 = vcombine.low %v2200_v35, %v2220_v37  ;;  %v2212_v62 = vld [vmem:[%s5101_s27 + $0x490] sm:$0xff] }
 0x2e5   : > { %3562 = vmatpush1.bf16.xpose.msra.mxu1 %v4176_v8  ;;  %v2191_v8 = vld [vmem:[%s5101_s27 + $0x3e8] sm:$0xff] }
 0x2e6   : > { %3195 = vmatpush1.bf16.xpose.msra.mxu0 %v4198_v16  ;;  %3563 = vmatprep.subr.bf16.mxu1 %v4217_v58  ;;  %v2211_v16 = vld [vmem:[%s5101_s27 + $0x488] sm:$0xff]  ;;  %v4178_v58 = vcombine.low %v2120_v13, %v2140_v15  ;;  %v2152_v13 = vld [vmem:[%s5101_s27 + $0x2b0] sm:$0xff] }
 0x2e7   : > { %3196 = vmatprep.subr.bf16.mxu0 %v4239_v9  ;;  %v4200_v9 = vcombine.low %v2151_v27, %v2171_v54  ;;  %v4241_v23 = vcombine.high %v2191_v8, %v2211_v16  ;;  %v4240_v0 = vcombine.low %v2191_v8, %v2211_v16  ;;  %v2172_v15 = vld [vmem:[%s5101_s27 + $0x350] sm:$0xff]  ;;  %v4140_v27 = vcombine.low %v2081_v4, %v2101_v10 }
 0x2e8   : > { %v4202_v8 = vcombine.low %v2152_v13, %v2172_v15 }
 0x2ed   : > { %3564 = vmatpush1.bf16.xpose.msra.mxu1 %v4216_v46  ;;  %v4259_v46 = vcombine.high %v2200_v35, %v2220_v37 }
 0x2ee   : > { %3197 = vmatpush1.bf16.xpose.msra.mxu0 %v4238_v3  ;;  %3565 = vmatprep.subr.bf16.mxu1 %v4257_v56  ;;  %v4123_v3 = vcombine.high %v2072_v36, %v2092_v14  ;;  %v2112_v56 = vld [vmem:[%s5101_s27 + $0x170] sm:$0xff] }
 0x2ef   : > { %3231 = vmatprep.subr.bf16.mxu0 %v4121_v55  ;;  %v2132_v55 = vld [vmem:[%s5101_s27 + $0x210] sm:$0xff] }
 0x2f0   : > { %v4162_v54 = vcombine.low %v2112_v56, %v2132_v55 }
 0x2f5   : > { %3223 = vmatmul.mubr.bf16.vlgmr.msra.gmra.mrb[44].mxu0 %v5932_v21  ;;  %3566 = vmatpush1.bf16.xpose.msra.mxu1 %v4256_v28  ;;  %v4163_v28 = vcombine.high %v2112_v56, %v2132_v55  ;;  %v2121_v21 = vld [vmem:[%s5101_s27 + $0x1b8] sm:$0xff] }
 0x2f6   : > { %3232 = vmatpush1.bf16.xpose.msra.mxu0 %v4120_v1  ;;  %3263 = vmatprep.mubr.bf16.mxu0 %v5933_v12  ;;  %v4141_v1 = vcombine.high %v2081_v4, %v2101_v10  ;;  %v2141_v12 = vld [vmem:[%s5101_s27 + $0x258] sm:$0xff] }
 0x2f7   : > { %3233 = vmatprep.subr.bf16.mxu0 %v4161_v42  ;;  %3600 = vmatprep.subr.bf16.mxu1 %v4139_v60  ;;  %v5936_v42 = vpack.c.bf16 %v5213_v51, %v5207_v41  ;;  %v5937_v60 = vpack.c.bf16 %v5282_v20, %v5279_v59  ;;  %v4181_v41 = vcombine.high %v2121_v21, %v2141_v12  ;;  %v5940_v59 = vld [vmem:[#allocation31_spill] sm:$0xff]  ;;  %v5941_v20 = vld [vmem:[#allocation32_spill] sm:$0xff] }
 0x2f8   : > { %v4203_v51 = vcombine.high %v2152_v13, %v2172_v15  ;;  %v4180_v47 = vcombine.low %v2121_v21, %v2141_v12  ;;  %v2122_v21 = vld [vmem:[%s5101_s27 + $0x1c0] sm:$0xff]  ;;  %v2153_v13 = vld [vmem:[%s5101_s27 + $0x2b8] sm:$0xff] }
 0x2f9   : > { %v2142_v12 = vld [vmem:[%s5101_s27 + $0x260] sm:$0xff]  ;;  %v2173_v15 = vld [vmem:[%s5101_s27 + $0x358] sm:$0xff] }
 0x2fc   : > { %3592 = vmatmul.mubr.bf16.vlgmr.msra.gmra.mrb[40].mxu1 %v5934_v6  ;;  %v2181_v6 = vld [vmem:[%s5101_s27 + $0x398] sm:$0xff] }
 0x2fd   : > { %3601 = vmatpush1.bf16.xpose.msra.mxu1 %v4138_v61  ;;  %3632 = vmatprep.mubr.bf16.mxu1 %v5935_v57  ;;  %v5938_v61 = vld [vmem:[#allocation28_spill] sm:$0xff]  ;;  %v2192_v57 = vld [vmem:[%s5101_s27 + $0x3f0] sm:$0xff] }
 0x2fe   : > { %3234 = vmatpush1.bf16.xpose.msra.mxu0 %v4160_v53  ;;  %3602 = vmatprep.subr.bf16.mxu1 %v4179_v32  ;;  %v5939_v53 = vpack.c.bf16 %v5426_v52, %v5938_v61  ;;  %v5942_v32 = vpack.c.bf16 %v5940_v59, %v5941_v20  ;;  %v4243_v16 = vcombine.high %v2192_v57, %v2212_v62  ;;  %v5949_v61 = vld [vmem:[#allocation30_spill] sm:$0xff]  ;;  %v2162_v20 = vld [vmem:[%s5101_s27 + $0x300] sm:$0xff] }
 0x2ff   : > { %3235 = vmatprep.subr.bf16.mxu0 %v4201_v49  ;;  %v2161_v49 = vld [vmem:[%s5101_s27 + $0x2f8] sm:$0xff]  ;;  %v4242_v37 = vcombine.low %v2192_v57, %v2212_v62  ;;  %v4182_v57 = vcombine.low %v2122_v21, %v2142_v12  ;;  %v4204_v62 = vcombine.low %v2153_v13, %v2173_v15 }
 0x300   : > { %v4221_v52 = vcombine.high %v2161_v49, %v2181_v6  ;;  %v4220_v35 = vcombine.low %v2161_v49, %v2181_v6  ;;  %v2193_v49 = vld [vmem:[%s5101_s27 + $0x3f8] sm:$0xff] }
 0x301   : > { %v2213_v6 = vld [vmem:[%s5101_s27 + $0x498] sm:$0xff] }
 0x305   : > { %3603 = vmatpush1.bf16.xpose.msra.mxu1 %v4178_v58  ;;  %v2201_v58 = vld [vmem:[%s5101_s27 + $0x438] sm:$0xff] }
 0x306   : > { %3236 = vmatpush1.bf16.xpose.msra.mxu0 %v4200_v9  ;;  %3604 = vmatprep.subr.bf16.mxu1 %v4219_v43  ;;  %v2221_v9 = vld [vmem:[%s5101_s27 + $0x4d8] sm:$0xff] }
 0x307   : > { %3237 = vmatprep.subr.bf16.mxu0 %v4241_v23  ;;  %v2073_v43 = vld [vmem:[%s5101_s27 + $0x38] sm:$0xff]  ;;  %v4261_v36 = vcombine.high %v2201_v58, %v2221_v9  ;;  %v4260_v56 = vcombine.low %v2201_v58, %v2221_v9  ;;  %v4244_v58 = vcombine.low %v2193_v49, %v2213_v6  ;;  %v4263_v9 = vcombine.high %v2202_v39, %v2222_v18 }
 0x308   : > { %v2093_v23 = vld [vmem:[%s5101_s27 + $0xd8] sm:$0xff] }
 0x309   : > { %v4125_v14 = vcombine.high %v2073_v43, %v2093_v23  ;;  %v4124_v55 = vcombine.low %v2073_v43, %v2093_v23  ;;  %v2114_v23 = vld [vmem:[%s5101_s27 + $0x180] sm:$0xff] }
 0x30d   : > { %3605 = vmatpush1.bf16.xpose.msra.mxu1 %v4218_v19  ;;  %v2113_v19 = vld [vmem:[%s5101_s27 + $0x178] sm:$0xff] }
 0x30e   : > { %3238 = vmatpush1.bf16.xpose.msra.mxu0 %v4240_v0  ;;  %3606 = vmatprep.subr.bf16.mxu1 %v4259_v46  ;;  %v2133_v0 = vld [vmem:[%s5101_s27 + $0x218] sm:$0xff]  ;;  %v2082_v46 = vld [vmem:[%s5101_s27 + $0x80] sm:$0xff] }
 0x30f   : > { %3272 = vmatprep.subr.bf16.mxu0 %v4123_v3  ;;  %v2102_v3 = vld [vmem:[%s5101_s27 + $0x120] sm:$0xff]  ;;  %v4165_v4 = vcombine.high %v2113_v19, %v2133_v0 }
 0x310   : > { %v4143_v10 = vcombine.high %v2082_v46, %v2102_v3 }
 0x315   : > { %3264 = vmatmul.mubr.bf16.vlgmr.msra.gmra.mrb[44].mxu0 %v5936_v42  ;;  %3607 = vmatpush1.bf16.xpose.msra.mxu1 %v4258_v29  ;;  %v5943_v29 = vld [vmem:[#allocation17_spill] sm:$0xff]  ;;  %v5947_v42 = vld [vmem:[#allocation26_spill] sm:$0xff] }
 0x316   : > { %3273 = vmatpush1.bf16.xpose.msra.mxu0 %v4122_v17  ;;  %3304 = vmatprep.mubr.bf16.mxu0 %v5937_v60  ;;  %v5944_v17 = vld [vmem:[#allocation16_spill] sm:$0xff] }
 0x317   : > { %3274 = vmatprep.subr.bf16.mxu0 %v4163_v28  ;;  %3641 = vmatprep.subr.bf16.mxu1 %v4141_v1  ;;  %v5945_v28 = vpack.c.bf16 %v5943_v29, %v5944_v17  ;;  %v5946_v1 = vld [vmem:[#allocation24_spill] sm:$0xff]  ;;  %v2123_v17 = vld [vmem:[%s5101_s27 + $0x1c8] sm:$0xff] }
 0x318   : > { %v5948_v60 = vpack.c.bf16 %v5946_v1, %v5947_v42  ;;  %v2154_v1 = vld [vmem:[%s5101_s27 + $0x2c0] sm:$0xff] }
 0x319   : > { %v2174_v42 = vld [vmem:[%s5101_s27 + $0x360] sm:$0xff] }
 0x31c   : > { %3633 = vmatmul.mubr.bf16.vlgmr.msra.gmra.mrb[40].mxu1 %v5939_v53  ;;  %v5950_v53 = vld [vmem:[#allocation29_spill] sm:$0xff] }
 0x31d   : > { %3642 = vmatpush1.bf16.xpose.msra.mxu1 %v4140_v27  ;;  %3673 = vmatprep.mubr.bf16.mxu1 %v5942_v32  ;;  %v4142_v27 = vcombine.low %v2082_v46, %v2102_v3  ;;  %v5951_v59 = vpack.c.bf16 %v5949_v61, %v5950_v53  ;;  %v2182_v32 = vld [vmem:[%s5101_s27 + $0x3a0] sm:$0xff]  ;;  %v5952_v3 = vld [vmem:[#allocation19_spill] sm:$0xff] }
 0x31e   : > { %3275 = vmatpush1.bf16.xpose.msra.mxu0 %v4162_v54  ;;  %3643 = vmatprep.subr.bf16.mxu1 %v4181_v41  ;;  %v4164_v54 = vcombine.low %v2113_v19, %v2133_v0  ;;  %v4183_v41 = vcombine.high %v2122_v21, %v2142_v12  ;;  %v2194_v61 = vld [vmem:[%s5101_s27 + $0x400] sm:$0xff] }
 0x31f   : > { %3276 = vmatprep.subr.bf16.mxu0 %v4203_v51  ;;  %v4205_v51 = vcombine.high %v2153_v13, %v2173_v15  ;;  %v4207_v13 = vcombine.high %v2154_v1, %v2174_v42  ;;  %v5958_v15 = vld [vmem:[#allocation35_spill] sm:$0xff]  ;;  %v2214_v53 = vld [vmem:[%s5101_s27 + $0x4a0] sm:$0xff] }
 0x325   : > { %3644 = vmatpush1.bf16.xpose.msra.mxu1 %v4180_v47  ;;  %v4223_v47 = vcombine.high %v2162_v20, %v2182_v32 }
 0x326   : > { %3277 = vmatpush1.bf16.xpose.msra.mxu0 %v4202_v8  ;;  %3645 = vmatprep.subr.bf16.mxu1 %v4221_v52  ;;  %v4245_v8 = vcombine.high %v2193_v49, %v2213_v6  ;;  %v2094_v52 = vld [vmem:[%s5101_s27 + $0xe0] sm:$0xff]  ;;  %v4247_v49 = vcombine.high %v2194_v61, %v2214_v53  ;;  %v2095_v6 = vld [vmem:[%s5101_s27 + $0xe8] sm:$0xff] }
 0x327   : > { %3278 = vmatprep.subr.bf16.mxu0 %v4243_v16  ;;  %v4222_v16 = vcombine.low %v2162_v20, %v2182_v32  ;;  %v4206_v20 = vcombine.low %v2154_v1, %v2174_v42  ;;  %v4227_v42 = vcombine.high %v2164_v25, %v2184_v50 }
 0x32d   : > { %3646 = vmatpush1.bf16.xpose.msra.mxu1 %v4220_v35  ;;  %v2134_v35 = vld [vmem:[%s5101_s27 + $0x220] sm:$0xff] }
 0x32e   : > { %3279 = vmatpush1.bf16.xpose.msra.mxu0 %v4242_v37  ;;  %3647 = vmatprep.subr.bf16.mxu1 %v4261_v36  ;;  %v2083_v37 = vld [vmem:[%s5101_s27 + $0x88] sm:$0xff]  ;;  %v4167_v0 = vcombine.high %v2114_v23, %v2134_v35  ;;  %v4166_v21 = vcombine.low %v2114_v23, %v2134_v35  ;;  %v5962_v35 = vld [vmem:[#allocation20_spill] sm:$0xff] }
 0x32f   : > { %3313 = vmatprep.subr.bf16.mxu0 %v4125_v14  ;;  %v2103_v36 = vld [vmem:[%s5101_s27 + $0x128] sm:$0xff]  ;;  %v4262_v14 = vcombine.low %v2202_v39, %v2222_v18 }
 0x330   : > { %v4145_v46 = vcombine.high %v2083_v37, %v2103_v36  ;;  %v2115_v39 = vld [vmem:[%s5101_s27 + $0x188] sm:$0xff] }
 0x331   : > { %v2135_v18 = vld [vmem:[%s5101_s27 + $0x228] sm:$0xff] }
 0x332   : > { %v5961_v23 = vld [vmem:[#allocation21_spill] sm:$0xff] }
 0x335   : > { %3305 = vmatmul.mubr.bf16.vlgmr.msra.gmra.mrb[44].mxu0 %v5945_v28  ;;  %3648 = vmatpush1.bf16.xpose.msra.mxu1 %v4260_v56  ;;  %v5953_v56 = vld [vmem:[#allocation18_spill] sm:$0xff]  ;;  %v2143_v28 = vld [vmem:[%s5101_s27 + $0x268] sm:$0xff] }
 0x336   : > { %3314 = vmatpush1.bf16.xpose.msra.mxu0 %v4124_v55  ;;  %3345 = vmatprep.mubr.bf16.mxu0 %v5948_v60  ;;  %v5954_v55 = vpack.c.bf16 %v5952_v3, %v5953_v56  ;;  %v4144_v60 = vcombine.low %v2083_v37, %v2103_v36  ;;  %v4185_v12 = vcombine.high %v2123_v17, %v2143_v28  ;;  %v2124_v36 = vld [vmem:[%s5101_s27 + $0x1d0] sm:$0xff] }
 0x337   : > { %3315 = vmatprep.subr.bf16.mxu0 %v4165_v4  ;;  %3682 = vmatprep.subr.bf16.mxu1 %v4143_v10  ;;  %v5955_v4 = vld [vmem:[#allocation25_spill] sm:$0xff]  ;;  %v5956_v10 = vld [vmem:[#allocation27_spill] sm:$0xff]  ;;  %v5963_v37 = vpack.c.bf16 %v5961_v23, %v5962_v35  ;;  %v4168_v3 = vcombine.low %v2115_v39, %v2135_v18 }
 0x338   : > { %v5957_v29 = vpack.c.bf16 %v5955_v4, %v5956_v10  ;;  %v5964_v4 = vld [vmem:[#allocation36_spill] sm:$0xff]  ;;  %v5965_v10 = vld [vmem:[#allocation34_spill] sm:$0xff] }
 0x33c   : > { %3674 = vmatmul.mubr.bf16.vlgmr.msra.gmra.mrb[40].mxu1 %v5951_v59  ;;  %v4184_v59 = vcombine.low %v2123_v17, %v2143_v28  ;;  %v2215_v17 = vld [vmem:[%s5101_s27 + $0x4a8] sm:$0xff] }
 0x33d   : > { %3683 = vmatpush1.bf16.xpose.msra.mxu1 %v4142_v27  ;;  %3714 = vmatprep.mubr.bf16.mxu1 %v2059_v22  ;;  %v2074_v22 = vld [vmem:[%s5101_s27 + $0x40] sm:$0xff]  ;;  %v5959_v27 = vld [vmem:[#allocation33_spill] sm:$0xff] }
 0x33e   : > { %3316 = vmatpush1.bf16.xpose.msra.mxu0 %v4164_v54  ;;  %3684 = vmatprep.subr.bf16.mxu1 %v4183_v41  ;;  %v4127_v43 = vcombine.high %v2074_v22, %v2094_v52  ;;  %v4126_v19 = vcombine.low %v2074_v22, %v2094_v52  ;;  %v5960_v54 = vpack.c.bf16 %v5958_v15, %v5959_v27  ;;  %v2163_v41 = vld [vmem:[%s5101_s27 + $0x308] sm:$0xff]  ;;  %v2084_v22 = vld [vmem:[%s5101_s27 + $0x90] sm:$0xff]  ;;  %v2105_v15 = vld [vmem:[%s5101_s27 + $0x138] sm:$0xff] }
 0x33f   : > { %3317 = vmatprep.subr.bf16.mxu0 %v4205_v51  ;;  %v2183_v51 = vld [vmem:[%s5101_s27 + $0x3a8] sm:$0xff]  ;;  %v2104_v52 = vld [vmem:[%s5101_s27 + $0x130] sm:$0xff]  ;;  %v4266_v27 = vcombine.low %v2204_v2, %v2224_v26 }
 0x340   : > { %v4225_v32 = vcombine.high %v2163_v41, %v2183_v51 }
 0x345   : > { %3685 = vmatpush1.bf16.xpose.msra.mxu1 %v4182_v57  ;;  %v4224_v57 = vcombine.low %v2163_v41, %v2183_v51  ;;  %v5967_v41 = vld [vmem:[#allocation23_spill] sm:$0xff]  ;;  %v5968_v51 = vld [vmem:[#allocation22_spill] sm:$0xff] }
 0x346   : > { %3318 = vmatpush1.bf16.xpose.msra.mxu0 %v4204_v62  ;;  %3686 = vmatprep.subr.bf16.mxu1 %v4223_v47  ;;  %v4246_v62 = vcombine.low %v2194_v61, %v2214_v53  ;;  %v4265_v47 = vcombine.high %v2203_v7, %v2223_v24  ;;  %v5969_v61 = vpack.c.bf16 %v5967_v41, %v5968_v51  ;;  %v2125_v53 = vld [vmem:[%s5101_s27 + $0x1d8] sm:$0xff] }
 0x347   : > { %3319 = vmatprep.subr.bf16.mxu0 %v4245_v8 }
 0x34d   : > { %3687 = vmatpush1.bf16.xpose.msra.mxu1 %v4222_v16  ;;  %v4264_v16 = vcombine.low %v2203_v7, %v2223_v24  ;;  %v2185_v7 = vld [vmem:[%s5101_s27 + $0x3b8] sm:$0xff] }
 0x34e   : > { %3320 = vmatpush1.bf16.xpose.msra.mxu0 %v4244_v58  ;;  %3688 = vmatprep.subr.bf16.mxu1 %v4263_v9  ;;  %v4169_v9 = vcombine.high %v2115_v39, %v2135_v18 }
 0x34f   : > { %3354 = vmatprep.subr.bf16.mxu0 %v4127_v43  ;;  %v4147_v43 = vcombine.high %v2084_v22, %v2104_v52 }
 0x355   : > { %3346 = vmatmul.mubr.bf16.vlgmr.msra.gmra.mrb[44].mxu0 %v5954_v55  ;;  %3689 = vmatpush1.bf16.xpose.msra.mxu1 %v4262_v14  ;;  %v2144_v14 = vld [vmem:[%s5101_s27 + $0x270] sm:$0xff] }
 0x356   : > { %3355 = vmatpush1.bf16.xpose.msra.mxu0 %v4126_v19  ;;  %3386 = vmatprep.mubr.bf16.mxu0 %v5957_v29  ;;  %v2155_v19 = vld [vmem:[%s5101_s27 + $0x2c8] sm:$0xff]  ;;  %v4187_v56 = vcombine.high %v2124_v36, %v2144_v14  ;;  %v5966_v29 = vpack.c.bf16 %v5964_v4, %v5965_v10  ;;  %v4186_v28 = vcombine.low %v2124_v36, %v2144_v14 }
 0x357   : > { %3356 = vmatprep.subr.bf16.mxu0 %v4167_v0  ;;  %3723 = vmatprep.subr.bf16.mxu1 %v4145_v46  ;;  %v2175_v0 = vld [vmem:[%s5101_s27 + $0x368] sm:$0xff]  ;;  %v4146_v46 = vcombine.low %v2084_v22, %v2104_v52 }
 0x358   : > { %v4209_v55 = vcombine.high %v2155_v19, %v2175_v0  ;;  %v4208_v1 = vcombine.low %v2155_v19, %v2175_v0 }
 0x35c   : > { %3715 = vmatmul.mubr.bf16.vlgmr.msra.gmra.mrb[40].mxu1 %v5960_v54 }
 0x35d   : > { %3724 = vmatpush1.bf16.xpose.msra.mxu1 %v4144_v60  ;;  %3755 = vmatprep.mubr.bf16.mxu1 %v2061_v63  ;;  %v2075_v63 = vld [vmem:[%s5101_s27 + $0x48] sm:$0xff] }
 0x35e   : > { %3357 = vmatpush1.bf16.xpose.msra.mxu0 %v4166_v21  ;;  %3725 = vmatprep.subr.bf16.mxu1 %v4185_v12  ;;  %v4129_v8 = vcombine.high %v2075_v63, %v2095_v6  ;;  %v4128_v58 = vcombine.low %v2075_v63, %v2095_v6  ;;  %v4267_v12 = vcombine.high %v2204_v2, %v2224_v26  ;;  %v2205_v6 = vld [vmem:[%s5101_s27 + $0x458] sm:$0xff] }
 0x35f   : > { %3358 = vmatprep.subr.bf16.mxu0 %v4207_v13  ;;  %v2085_v13 = vld [vmem:[%s5101_s27 + $0x98] sm:$0xff] }
 0x360   : > { %v4149_v54 = vcombine.high %v2085_v13, %v2105_v15 }
 0x365   : > { %3726 = vmatpush1.bf16.xpose.msra.mxu1 %v4184_v59  ;;  %v2145_v59 = vld [vmem:[%s5101_s27 + $0x278] sm:$0xff] }
 0x366   : > { %3359 = vmatpush1.bf16.xpose.msra.mxu0 %v4206_v20  ;;  %3727 = vmatprep.subr.bf16.mxu1 %v4225_v32  ;;  %v4148_v20 = vcombine.low %v2085_v13, %v2105_v15  ;;  %v4189_v32 = vcombine.high %v2125_v53, %v2145_v59  ;;  %v4188_v24 = vcombine.low %v2125_v53, %v2145_v59 }
 0x367   : > { %3360 = vmatprep.subr.bf16.mxu0 %v4247_v49  ;;  %v2165_v49 = vld [vmem:[%s5101_s27 + $0x318] sm:$0xff] }
 0x368   : > { %v4229_v63 = vcombine.high %v2165_v49, %v2185_v7 }
 0x36d   : > { %3728 = vmatpush1.bf16.xpose.msra.mxu1 %v4224_v57  ;;  %v2225_v57 = vld [vmem:[%s5101_s27 + $0x4f8] sm:$0xff] }
 0x36e   : > { %3361 = vmatpush1.bf16.xpose.msra.mxu0 %v4246_v62  ;;  %3729 = vmatprep.subr.bf16.mxu1 %v4265_v47  ;;  %v4228_v62 = vcombine.low %v2165_v49, %v2185_v7  ;;  %v4269_v47 = vcombine.high %v2205_v6, %v2225_v57  ;;  %v4268_v38 = vcombine.low %v2205_v6, %v2225_v57 }
 0x36f   : > { %3395 = vmatprep.subr.bf16.mxu0 %v4129_v8 }
 0x375   : > { %3387 = vmatmul.mubr.bf16.vlgmr.msra.gmra.mrb[44].mxu0 %v5963_v37  ;;  %3730 = vmatpush1.bf16.xpose.msra.mxu1 %v4264_v16 }
 0x376   : > { %3396 = vmatpush1.bf16.xpose.msra.mxu0 %v4128_v58  ;;  %3427 = vmatprep.mubr.bf16.mxu0 %v2045_v34  ;;  %v2195_v34 = vld [vmem:[%s5101_s27 + $0x408] sm:$0xff] }
 0x377   : > { %3397 = vmatprep.subr.bf16.mxu0 %v4169_v9  ;;  %3764 = vmatprep.subr.bf16.mxu1 %v4147_v43  ;;  %v4249_v60 = vcombine.high %v2195_v34, %v2215_v17  ;;  %v4248_v21 = vcombine.low %v2195_v34, %v2215_v17 }
 0x37c   : > { %3756 = vmatmul.mubr.bf16.vlgmr.msra.gmra.mrb[40].mxu1 %v5966_v29 }
 0x37d   : > { %3765 = vmatpush1.bf16.xpose.msra.mxu1 %v4146_v46  ;;  %3796 = vmatprep.mubr.bf16.mxu1 %v2063_v11  ;;  %v4226_v11 = vcombine.low %v2164_v25, %v2184_v50 }
 0x37e   : > { %3398 = vmatpush1.bf16.xpose.msra.mxu0 %v4168_v3  ;;  %3766 = vmatprep.subr.bf16.mxu1 %v4187_v56 }
 0x37f   : > { %3399 = vmatprep.subr.bf16.mxu0 %v4209_v55 }
 0x385   : > { %3767 = vmatpush1.bf16.xpose.msra.mxu1 %v4186_v28 }
 0x386   : > { %3400 = vmatpush1.bf16.xpose.msra.mxu0 %v4208_v1  ;;  %3768 = vmatprep.subr.bf16.mxu1 %v4227_v42 }
 0x387   : > { %3401 = vmatprep.subr.bf16.mxu0 %v4249_v60 }
 0x38d   : > { %3769 = vmatpush1.bf16.xpose.msra.mxu1 %v4226_v11 }
 0x38e   : > { %3402 = vmatpush1.bf16.xpose.msra.mxu0 %v4248_v21  ;;  %3770 = vmatprep.subr.bf16.mxu1 %v4267_v12 }
 0x395   : > { %3428 = vmatmul.mubr.bf16.vlgmr.msra.gmra.mrb[44].mxu0 %v5969_v61  ;;  %3771 = vmatpush1.bf16.xpose.msra.mxu1 %v4266_v27 }
 0x396   : > { %3805 = vmatprep.subr.bf16.mxu1 %v4149_v54 }
 0x39c   : > { %3797 = vmatmul.mubr.bf16.vlgmr.msra.gmra.mrb[40].mxu1 %v2062_v44 }
 0x39d   : > { %3806 = vmatpush1.bf16.xpose.msra.mxu1 %v4148_v20  ;;  %3837 = vmatprep.mubr.bf16.mxu1 %v2065_v45 }
 0x39e   : > { %3807 = vmatprep.subr.bf16.mxu1 %v4189_v32 }
 0x3a5   : > { %3808 = vmatpush1.bf16.xpose.msra.mxu1 %v4188_v24 }
 0x3a6   : > { %3809 = vmatprep.subr.bf16.mxu1 %v4229_v63 }
 0x3ad   : > { %3810 = vmatpush1.bf16.xpose.msra.mxu1 %v4228_v62 }
 0x3ae   : > { %3811 = vmatprep.subr.bf16.mxu1 %v4269_v47 }
 0x3b5   : > { %3812 = vmatpush1.bf16.xpose.msra.mxu1 %v4268_v38 }
 0x3bc   : > { %3838 = vmatmul.mubr.bf16.vlgmr.msra.gmra.mrb[40].mxu1 %v2064_v30 }
 0x468   : > { %v3429_v31 = vpop.f32.mrb[44].mxu0 }
 0x469   : > { %v3431_v44 = vpop.f32.mrb[45].mxu0 }
 0x46a   : > { %v3432_v5 = vpop.f32.mrb[46].mxu0 }
 0x46b   : > { %v3434_v40 = vpop.f32.mrb[47].mxu0 }
 0x48f   : > { %v3839_v45 = vpop.f32.mrb[40].mxu1 }
 0x490   : > { %v4300_v8 = vadd.f32 %v3839_v45, %v3429_v31  ;;  %v3841_v39 = vpop.f32.mrb[41].mxu1 }
 0x491   : > { %v3842_v18 = vpop.f32.mrb[42].mxu1 }
 0x492   : > { %3851 = vst.msk [vmem:[%s345_s15] sm:$0xff] %vm3850_vm1, %v4300_v8  ;;  %v4301_v22 = vadd.f32 %v3842_v18, %v3432_v5  ;;  %v3844_v33 = vpop.f32.mrb[43].mxu1 }
 0x494   : > { %3852 = vst.msk [vmem:[%s345_s15 + $0x8] sm:$0xff] %vm3850_vm1, %v4301_v22 }
 0x495 PF: > { %s20_s23 = sadd.s32 1, %s4677_s23   ;;  %s5972_s9 = sld [smem:[#allocation15_spill]] }
 0x496   : > { %p17_p1 = scmp.ge.s32.totalorder %s20_s23, 4   ;;  %s5973_s6 = sld [smem:[#allocation14_spill]] }
 0x497   : > { %s5974_s18 = smov %s4661_s19  ;;  %s5975_s19 = smov %s4665_s20 }
 0x498   : > { %s5977_s21 = smov %s4673_s22  ;;  %19 = sbr.rel (!%p17_p1) target bundleno = 10 (0xa), region = 112 }
 0x49b   : > { %s5976_s20 = smov %s5972_s9 }
 0x49c   : > { %s5978_s22 = smov %s5973_s6 }
 0x49f   :  { %3885 = vsyncpa [#allocation3], 1 }
 0x4a0   :  { %3887 = vsyncpa [#allocation3 + $0x1], 1 }
 0x4a1   :  { %3888 = vsyncpa [#allocation5], 1 }
 0x4a2   :  { %3889 = vsyncpa [#allocation8], 1 }
 0x4a3   :  { %3891 = vsyncpa [#allocation8 + $0x1], 1 }

</bundles_post_ra>
